<compile_context>
chip_gen: v5e
topology: v5e:2x2
jax: 0.10.0
libtpu: 0.0.40
codegen_flags: <defaults>
</compile_context>

<pallas_src>
import jax
import jax.numpy as jnp
from jax.experimental import pallas as pl
from jax.experimental.pallas import tpu as pltpu

HEADS1, CH1 = 4, 16          # conv1: GATConv(F, 16, heads=4)   -> 64
HEADS2, CH2 = 8, 32          # conv2: GATConv(64, 32, heads=8)  -> 256
D1 = HEADS1 * CH1            # 64
D2 = HEADS2 * CH2            # 256
DJ = D1 + D2                 # 320 = JumpingKnowledge('cat') width


# --------------------------------------------------------------------------
# Host-side constant builders (hoisted out of the kernel, per review)
# --------------------------------------------------------------------------
def _gat_selectors(asrc, adst, heads, out_ch):
    """Per-head block-sum selectors with the attention vectors folded in.

    sel_dst[k, h]  = att_dst[k] * (k // C == h)   -> a_dst  = xw @ sel_dst      [N, H]
    sel_srcT[h, k] = att_src[k] * (k // C == h)   -> a_srcT = sel_srcT . xw^T   [H, N]
    """
    hc = heads * out_ch
    head_of = jnp.arange(hc) // out_ch
    sel = (head_of[:, None] == jnp.arange(heads)[None, :]).astype(jnp.float32)  # [HC, H]
    sel_dst = sel * adst.reshape(hc, 1)
    sel_src_t = sel.T * asrc.reshape(1, hc)
    return sel_dst, sel_src_t


def _block_diag_mask(heads, out_ch, n):
    """bd[h*N + j, h'*C + c] = 1.0 iff h == h'  (shape [H*N, H*C])."""
    row_head = jnp.arange(heads * n)[:, None] // n
    col_head = jnp.arange(heads * out_ch)[None, :] // out_ch
    return (row_head == col_head).astype(jnp.float32)


# --------------------------------------------------------------------------
# Fused forward kernel
# --------------------------------------------------------------------------
def pure_gat_kernel(x_ref, adj_ref, pool_ref,
                    w1_ref, seld1_ref, sels1_ref, b1_ref, bd1_ref,
                    w2_ref, seld2_ref, sels2_ref, b2_ref, bd2_ref,
                    fc1w_ref, fc1b_ref, fc2w_ref, fc2b_ref,
                    out_ref, jump_ref):

    def gat_layer(x_in, w_r, seld_r, sels_r, b_r, bd_r, heads, out_ch, col_off):
        hc = heads * out_ch
        xw = jnp.dot(x_in, w_r[...], preferred_element_type=jnp.float32)      # [N, H*C]

        # Per-head attention logit projections: one lane-dense MXU op each
        # (attention vectors are folded into the host-built selectors).
        a_dst = jnp.dot(xw, seld_r[...],
                        preferred_element_type=jnp.float32)                   # [N, H]
        a_src_t = jax.lax.dot_general(sels_r[...], xw,
                                      (((1,), (1,)), ((), ())),
                                      preferred_element_type=jnp.float32)     # [H, N]

        # Additive edge mask: 0 on edges, -1e30 off edges (bf16 adj read once,
        # scoped to this layer). Makes the row-max edge-only and drives masked
        # exp terms to exactly 0 -- no post-exp multiply, no NaN hazard.
        edge_bias = jnp.where(adj_ref[...] > 0,
                              jnp.float32(0.0), jnp.float32(-1e30))           # [N, N]

        # Per-head masked softmax (VPU/EUP work on [N, N] tiles); the alphas
        # are kept in-register and stacked along lanes.
        alphas = []
        for h in range(heads):
            e = a_dst[:, h:h + 1] + a_src_t[h:h + 1, :]      # [N, N], e[i,j]: edge j->i
            e = jnp.where(e > 0.0, e, 0.2 * e)               # LeakyReLU(0.2)
            e = e + edge_bias                                # softmax over edges only
            e = e - jnp.max(e, axis=1, keepdims=True)        # masked row-max (finite)
            p = jnp.exp(e)                                   # non-edges underflow to 0
            denom = jnp.sum(p, axis=1, keepdims=True)        # >= exp(0) = 1
            alphas.append(p * pl.reciprocal(denom, approx=True))   # EUP reciprocal
        alpha = jnp.concatenate(alphas, axis=1)              # [N, H*N]

        # Batched-head aggregation: block-diagonal Xw, ONE MXU matmul,
        # ONE contiguous lane-dense store per layer.
        xw_bd = jnp.concatenate([xw] * heads, axis=0) * bd_r[...]             # [H*N, H*C]
        out = jnp.dot(alpha, xw_bd, preferred_element_type=jnp.float32) + b_r[...]
        jump_ref[:, col_off:col_off + hc] = jnp.maximum(out, 0.0)             # fused F.relu

    # conv1 + relu  -> jump[:, 0:64]
    gat_layer(x_ref[...], w1_ref, seld1_ref, sels1_ref, b1_ref, bd1_ref,
              HEADS1, CH1, 0)
    # conv2 + relu  -> jump[:, 64:320]  (input = relu(x1) read back from scratch)
    gat_layer(jump_ref[:, 0:D1], w2_ref, seld2_ref, sels2_ref, b2_ref, bd2_ref,
              HEADS2, CH2, D1)

    # global_mean_pool + fc1(ReLU) + fc2, all on the in-VMEM JK buffer
    pooled = jnp.dot(pool_ref[...], jump_ref[...],
                     preferred_element_type=jnp.float32)                      # [G, 320]
    h1 = jnp.dot(pooled, fc1w_ref[...],
                 preferred_element_type=jnp.float32) + fc1b_ref[...]
    h1 = jnp.maximum(h1, 0.0)                                                 # [G, 128]
    out_ref[...] = jnp.dot(h1, fc2w_ref[...],
                           preferred_element_type=jnp.float32) + fc2b_ref[...]


# --------------------------------------------------------------------------
# Wrapper
# --------------------------------------------------------------------------
def pure_gat_forward(params, x, adj, pool_mat):
    n = x.shape[0]
    g = pool_mat.shape[0]

    # Host-precomputed constants (tiny; in a real loop build these once).
    seld1, sels1 = _gat_selectors(params["asrc1"], params["adst1"], HEADS1, CH1)
    seld2, sels2 = _gat_selectors(params["asrc2"], params["adst2"], HEADS2, CH2)
    bd1 = _block_diag_mask(HEADS1, CH1, n)      # [4*N, 64]
    bd2 = _block_diag_mask(HEADS2, CH2, n)      # [8*N, 256]

    vmem = pl.BlockSpec(memory_space=pltpu.MemorySpace.VMEM)
    out = pl.pallas_call(
        pure_gat_kernel,
        out_shape=jax.ShapeDtypeStruct((g, 1), jnp.float32),
        in_specs=[vmem] * 17,
        out_specs=vmem,
        scratch_shapes=[pltpu.VMEM((n, DJ), jnp.float32)],   # JK('cat') buffer
        compiler_params=pltpu.CompilerParams(vmem_limit_bytes=32 * 1024 * 1024),
    )(x, adj, pool_mat,
      params["w1"], seld1, sels1, params["b1"], bd1,
      params["w2"], seld2, sels2, params["b2"], bd2,
      params["fc1_w"], params["fc1_b"], params["fc2_w"], params["fc2_b"])
    return out.reshape(-1)                                    # .flatten()


def init_params(key, num_node_features):
    ks = jax.random.split(key, 12)
    f = num_node_features
    s = 0.1
    return {
        # conv1: GATConv(f, 16, heads=4); att vectors stored flat [1, H*C]
        "w1":    s * jax.random.normal(ks[0], (f, D1), jnp.float32),
        "asrc1": s * jax.random.normal(ks[1], (1, D1), jnp.float32),
        "adst1": s * jax.random.normal(ks[2], (1, D1), jnp.float32),
        "b1":    s * jax.random.normal(ks[3], (1, D1), jnp.float32),
        # conv2: GATConv(64, 32, heads=8)
        "w2":    s * jax.random.normal(ks[4], (D1, D2), jnp.float32),
        "asrc2": s * jax.random.normal(ks[5], (1, D2), jnp.float32),
        "adst2": s * jax.random.normal(ks[6], (1, D2), jnp.float32),
        "b2":    s * jax.random.normal(ks[7], (1, D2), jnp.float32),
        # fc1: Linear(320, 128), fc2: Linear(128, 1)
        "fc1_w": s * jax.random.normal(ks[8], (DJ, 128), jnp.float32),
        "fc1_b": s * jax.random.normal(ks[9], (1, 128), jnp.float32),
        "fc2_w": s * jax.random.normal(ks[10], (128, 1), jnp.float32),
        "fc2_b": s * jax.random.normal(ks[11], (1, 1), jnp.float32),
    }


if __name__ == "__main__":
    N, F, E, G = 16, 8, 40, 2          # nodes, node features, edges, graphs

    key = jax.random.PRNGKey(0)
    k_x, k_src, k_dst, k_p = jax.random.split(key, 4)

    # data.x
    x = jax.random.normal(k_x, (N, F), jnp.float32)
    # data.edge_index  (edge_index[0] = src j, edge_index[1] = dst i)
    src = jax.random.randint(k_src, (E,), 0, N)
    dst = jax.random.randint(k_dst, (E,), 0, N)
    # data.batch: first half of nodes -> graph 0, second half -> graph 1
    batch = jnp.repeat(jnp.arange(G), N // G)

    # dense adjacency mask (bf16): adj[i, j] = 1 iff edge j -> i; self-loops
    # added (GATConv add_self_loops default).  Duplicate edges collapse to one.
    adj = jnp.zeros((N, N), jnp.bfloat16).at[dst, src].set(1.0)
    adj = jnp.maximum(adj, jnp.eye(N, dtype=jnp.bfloat16))

    # global_mean_pool as a [G, N] matrix
    one_hot = jax.nn.one_hot(batch, G, dtype=jnp.float32)          # [N, G]
    counts = jnp.sum(one_hot, axis=0)                              # [G]
    pool_mat = one_hot.T / counts[:, None]                         # [G, N]

    params = init_params(k_p, F)

    out = pure_gat_forward(params, x, adj, pool_mat)
    jax.block_until_ready(out)
    assert out.shape == (G,)
    assert bool(jnp.all(jnp.isfinite(out)))
    print("KERNEL_OK")
</pallas_src>

<mosaic_0001>
module attributes {stable_mosaic.version = 11 : i64} {
  func.func @pure_gat_kernel(%arg0: memref<16x8xf32, #tpu.memory_space<vmem>>, %arg1: memref<16x16xbf16, #tpu.memory_space<vmem>>, %arg2: memref<2x16xf32, #tpu.memory_space<vmem>>, %arg3: memref<8x64xf32, #tpu.memory_space<vmem>>, %arg4: memref<64x4xf32, #tpu.memory_space<vmem>>, %arg5: memref<4x64xf32, #tpu.memory_space<vmem>>, %arg6: memref<1x64xf32, #tpu.memory_space<vmem>>, %arg7: memref<64x64xf32, #tpu.memory_space<vmem>>, %arg8: memref<64x256xf32, #tpu.memory_space<vmem>>, %arg9: memref<256x8xf32, #tpu.memory_space<vmem>>, %arg10: memref<8x256xf32, #tpu.memory_space<vmem>>, %arg11: memref<1x256xf32, #tpu.memory_space<vmem>>, %arg12: memref<128x256xf32, #tpu.memory_space<vmem>>, %arg13: memref<320x128xf32, #tpu.memory_space<vmem>>, %arg14: memref<1x128xf32, #tpu.memory_space<vmem>>, %arg15: memref<128x1xf32, #tpu.memory_space<vmem>>, %arg16: memref<1x1xf32, #tpu.memory_space<vmem>>, %arg17: memref<2x1xf32, #tpu.memory_space<vmem>>, %arg18: memref<16x320xf32, #tpu.memory_space<vmem>>) attributes {dimension_semantics = [], scalar_prefetch = 0 : i64, scratch_operands = 1 : i64, tpu.core_type = #tpu.core_type<tc>} {
    %c0 = arith.constant 0 : index
    %c0_0 = arith.constant 0 : index
    %0 = vector.load %arg0[%c0, %c0_0] : memref<16x8xf32, #tpu.memory_space<vmem>>, vector<16x8xf32>
    %c0_1 = arith.constant 0 : index
    %c0_2 = arith.constant 0 : index
    %1 = vector.load %arg3[%c0_1, %c0_2] : memref<8x64xf32, #tpu.memory_space<vmem>>, vector<8x64xf32>
    %cst = arith.constant dense<0.000000e+00> : vector<16x64xf32>
    %2 = tpu.matmul %0, %1, %cst {dimension_numbers = #tpu.dot_dimension_numbers<[1], [0], [0], [1], [0, 0, 1, 1], [], []>} : vector<16x8xf32>, vector<8x64xf32>, vector<16x64xf32> -> vector<16x64xf32>
    %c0_3 = arith.constant 0 : index
    %c0_4 = arith.constant 0 : index
    %3 = vector.load %arg4[%c0_3, %c0_4] : memref<64x4xf32, #tpu.memory_space<vmem>>, vector<64x4xf32>
    %cst_5 = arith.constant dense<0.000000e+00> : vector<16x4xf32>
    %4 = tpu.matmul %2, %3, %cst_5 {dimension_numbers = #tpu.dot_dimension_numbers<[1], [0], [0], [1], [0, 0, 1, 1], [], []>} : vector<16x64xf32>, vector<64x4xf32>, vector<16x4xf32> -> vector<16x4xf32>
    %c0_6 = arith.constant 0 : index
    %c0_7 = arith.constant 0 : index
    %5 = vector.load %arg5[%c0_6, %c0_7] : memref<4x64xf32, #tpu.memory_space<vmem>>, vector<4x64xf32>
    %cst_8 = arith.constant dense<0.000000e+00> : vector<4x16xf32>
    %6 = tpu.matmul %5, %2, %cst_8 {dimension_numbers = #tpu.dot_dimension_numbers<[1], [1], [0], [0], [0, 0, 1, 0], [], []>} : vector<4x64xf32>, vector<16x64xf32>, vector<4x16xf32> -> vector<4x16xf32>
    %c0_9 = arith.constant 0 : index
    %c0_10 = arith.constant 0 : index
    %7 = vector.load %arg1[%c0_9, %c0_10] : memref<16x16xbf16, #tpu.memory_space<vmem>>, vector<16x16xbf16>
    %cst_11 = arith.constant 0.000000e+00 : bf16
    %8 = vector.broadcast %cst_11 : bf16 to vector<16x16xbf16>
    %9 = arith.cmpf ogt, %7, %8 : vector<16x16xbf16>
    %cst_12 = arith.constant 0.000000e+00 : f32
    %cst_13 = arith.constant -1.000000e+30 : f32
    %10 = vector.broadcast %cst_12 : f32 to vector<16x16xf32>
    %11 = vector.broadcast %cst_13 : f32 to vector<16x16xf32>
    %12 = arith.select %9, %10, %11 : vector<16x16xi1>, vector<16x16xf32>
    %13 = vector.extract_strided_slice %4 {offsets = [0, 0], sizes = [16, 1], strides = [1, 1]} : vector<16x4xf32> to vector<16x1xf32>
    %14 = vector.extract_strided_slice %6 {offsets = [0, 0], sizes = [1, 16], strides = [1, 1]} : vector<4x16xf32> to vector<1x16xf32>
    %15 = vector.broadcast %13 : vector<16x1xf32> to vector<16x16xf32>
    %16 = vector.broadcast %14 : vector<1x16xf32> to vector<16x16xf32>
    %17 = arith.addf %15, %16 : vector<16x16xf32>
    %cst_14 = arith.constant 0.000000e+00 : f32
    %18 = vector.broadcast %cst_14 : f32 to vector<16x16xf32>
    %19 = arith.cmpf ogt, %17, %18 : vector<16x16xf32>
    %cst_15 = arith.constant 2.000000e-01 : f32
    %20 = vector.broadcast %cst_15 : f32 to vector<16x16xf32>
    %21 = arith.mulf %20, %17 : vector<16x16xf32>
    %22 = arith.select %19, %17, %21 : vector<16x16xi1>, vector<16x16xf32>
    %23 = arith.addf %22, %12 : vector<16x16xf32>
    %cst_16 = arith.constant dense<0xFF800000> : vector<16xf32>
    %24 = vector.multi_reduction <maximumf>, %23, %cst_16 [1] : vector<16x16xf32> to vector<16xf32>
    %25 = vector.shape_cast %24 : vector<16xf32> to vector<16x1xf32>
    %26 = vector.broadcast %25 : vector<16x1xf32> to vector<16x16xf32>
    %27 = arith.subf %23, %26 : vector<16x16xf32>
    %28 = math.exp %27 : vector<16x16xf32>
    %cst_17 = arith.constant dense<0.000000e+00> : vector<16xf32>
    %29 = vector.multi_reduction <add>, %28, %cst_17 [1] : vector<16x16xf32> to vector<16xf32>
    %30 = vector.shape_cast %29 : vector<16xf32> to vector<16x1xf32>
    %31 = tpu.reciprocal %30 {approx = true} : vector<16x1xf32> -> vector<16x1xf32>
    %32 = vector.broadcast %31 : vector<16x1xf32> to vector<16x16xf32>
    %33 = arith.mulf %28, %32 : vector<16x16xf32>
    %34 = vector.extract_strided_slice %4 {offsets = [0, 1], sizes = [16, 1], strides = [1, 1]} : vector<16x4xf32> to vector<16x1xf32>
    %35 = vector.extract_strided_slice %6 {offsets = [1, 0], sizes = [1, 16], strides = [1, 1]} : vector<4x16xf32> to vector<1x16xf32>
    %36 = vector.broadcast %34 : vector<16x1xf32> to vector<16x16xf32>
    %37 = vector.broadcast %35 : vector<1x16xf32> to vector<16x16xf32>
    %38 = arith.addf %36, %37 : vector<16x16xf32>
    %cst_18 = arith.constant 0.000000e+00 : f32
    %39 = vector.broadcast %cst_18 : f32 to vector<16x16xf32>
    %40 = arith.cmpf ogt, %38, %39 : vector<16x16xf32>
    %cst_19 = arith.constant 2.000000e-01 : f32
    %41 = vector.broadcast %cst_19 : f32 to vector<16x16xf32>
    %42 = arith.mulf %41, %38 : vector<16x16xf32>
    %43 = arith.select %40, %38, %42 : vector<16x16xi1>, vector<16x16xf32>
    %44 = arith.addf %43, %12 : vector<16x16xf32>
    %cst_20 = arith.constant dense<0xFF800000> : vector<16xf32>
    %45 = vector.multi_reduction <maximumf>, %44, %cst_20 [1] : vector<16x16xf32> to vector<16xf32>
    %46 = vector.shape_cast %45 : vector<16xf32> to vector<16x1xf32>
    %47 = vector.broadcast %46 : vector<16x1xf32> to vector<16x16xf32>
    %48 = arith.subf %44, %47 : vector<16x16xf32>
    %49 = math.exp %48 : vector<16x16xf32>
    %cst_21 = arith.constant dense<0.000000e+00> : vector<16xf32>
    %50 = vector.multi_reduction <add>, %49, %cst_21 [1] : vector<16x16xf32> to vector<16xf32>
    %51 = vector.shape_cast %50 : vector<16xf32> to vector<16x1xf32>
    %52 = tpu.reciprocal %51 {approx = true} : vector<16x1xf32> -> vector<16x1xf32>
    %53 = vector.broadcast %52 : vector<16x1xf32> to vector<16x16xf32>
    %54 = arith.mulf %49, %53 : vector<16x16xf32>
    %55 = vector.extract_strided_slice %4 {offsets = [0, 2], sizes = [16, 1], strides = [1, 1]} : vector<16x4xf32> to vector<16x1xf32>
    %56 = vector.extract_strided_slice %6 {offsets = [2, 0], sizes = [1, 16], strides = [1, 1]} : vector<4x16xf32> to vector<1x16xf32>
    %57 = vector.broadcast %55 : vector<16x1xf32> to vector<16x16xf32>
    %58 = vector.broadcast %56 : vector<1x16xf32> to vector<16x16xf32>
    %59 = arith.addf %57, %58 : vector<16x16xf32>
    %cst_22 = arith.constant 0.000000e+00 : f32
    %60 = vector.broadcast %cst_22 : f32 to vector<16x16xf32>
    %61 = arith.cmpf ogt, %59, %60 : vector<16x16xf32>
    %cst_23 = arith.constant 2.000000e-01 : f32
    %62 = vector.broadcast %cst_23 : f32 to vector<16x16xf32>
    %63 = arith.mulf %62, %59 : vector<16x16xf32>
    %64 = arith.select %61, %59, %63 : vector<16x16xi1>, vector<16x16xf32>
    %65 = arith.addf %64, %12 : vector<16x16xf32>
    %cst_24 = arith.constant dense<0xFF800000> : vector<16xf32>
    %66 = vector.multi_reduction <maximumf>, %65, %cst_24 [1] : vector<16x16xf32> to vector<16xf32>
    %67 = vector.shape_cast %66 : vector<16xf32> to vector<16x1xf32>
    %68 = vector.broadcast %67 : vector<16x1xf32> to vector<16x16xf32>
    %69 = arith.subf %65, %68 : vector<16x16xf32>
    %70 = math.exp %69 : vector<16x16xf32>
    %cst_25 = arith.constant dense<0.000000e+00> : vector<16xf32>
    %71 = vector.multi_reduction <add>, %70, %cst_25 [1] : vector<16x16xf32> to vector<16xf32>
    %72 = vector.shape_cast %71 : vector<16xf32> to vector<16x1xf32>
    %73 = tpu.reciprocal %72 {approx = true} : vector<16x1xf32> -> vector<16x1xf32>
    %74 = vector.broadcast %73 : vector<16x1xf32> to vector<16x16xf32>
    %75 = arith.mulf %70, %74 : vector<16x16xf32>
    %76 = vector.extract_strided_slice %4 {offsets = [0, 3], sizes = [16, 1], strides = [1, 1]} : vector<16x4xf32> to vector<16x1xf32>
    %77 = vector.extract_strided_slice %6 {offsets = [3, 0], sizes = [1, 16], strides = [1, 1]} : vector<4x16xf32> to vector<1x16xf32>
    %78 = vector.broadcast %76 : vector<16x1xf32> to vector<16x16xf32>
    %79 = vector.broadcast %77 : vector<1x16xf32> to vector<16x16xf32>
    %80 = arith.addf %78, %79 : vector<16x16xf32>
    %cst_26 = arith.constant 0.000000e+00 : f32
    %81 = vector.broadcast %cst_26 : f32 to vector<16x16xf32>
    %82 = arith.cmpf ogt, %80, %81 : vector<16x16xf32>
    %cst_27 = arith.constant 2.000000e-01 : f32
    %83 = vector.broadcast %cst_27 : f32 to vector<16x16xf32>
    %84 = arith.mulf %83, %80 : vector<16x16xf32>
    %85 = arith.select %82, %80, %84 : vector<16x16xi1>, vector<16x16xf32>
    %86 = arith.addf %85, %12 : vector<16x16xf32>
    %cst_28 = arith.constant dense<0xFF800000> : vector<16xf32>
    %87 = vector.multi_reduction <maximumf>, %86, %cst_28 [1] : vector<16x16xf32> to vector<16xf32>
    %88 = vector.shape_cast %87 : vector<16xf32> to vector<16x1xf32>
    %89 = vector.broadcast %88 : vector<16x1xf32> to vector<16x16xf32>
    %90 = arith.subf %86, %89 : vector<16x16xf32>
    %91 = math.exp %90 : vector<16x16xf32>
    %cst_29 = arith.constant dense<0.000000e+00> : vector<16xf32>
    %92 = vector.multi_reduction <add>, %91, %cst_29 [1] : vector<16x16xf32> to vector<16xf32>
    %93 = vector.shape_cast %92 : vector<16xf32> to vector<16x1xf32>
    %94 = tpu.reciprocal %93 {approx = true} : vector<16x1xf32> -> vector<16x1xf32>
    %95 = vector.broadcast %94 : vector<16x1xf32> to vector<16x16xf32>
    %96 = arith.mulf %91, %95 : vector<16x16xf32>
    %97 = tpu.concatenate %33, %54, %75, %96 in 1 : vector<16x16xf32>, vector<16x16xf32>, vector<16x16xf32>, vector<16x16xf32> -> vector<16x64xf32>
    %98 = tpu.concatenate %2, %2, %2, %2 in 0 : vector<16x64xf32>, vector<16x64xf32>, vector<16x64xf32>, vector<16x64xf32> -> vector<64x64xf32>
    %c0_30 = arith.constant 0 : index
    %c0_31 = arith.constant 0 : index
    %99 = vector.load %arg7[%c0_30, %c0_31] : memref<64x64xf32, #tpu.memory_space<vmem>>, vector<64x64xf32>
    %100 = arith.mulf %98, %99 : vector<64x64xf32>
    %cst_32 = arith.constant dense<0.000000e+00> : vector<16x64xf32>
    %101 = tpu.matmul %97, %100, %cst_32 {dimension_numbers = #tpu.dot_dimension_numbers<[1], [0], [0], [1], [0, 0, 1, 1], [], []>} : vector<16x64xf32>, vector<64x64xf32>, vector<16x64xf32> -> vector<16x64xf32>
    %c0_33 = arith.constant 0 : index
    %c0_34 = arith.constant 0 : index
    %102 = vector.load %arg6[%c0_33, %c0_34] : memref<1x64xf32, #tpu.memory_space<vmem>>, vector<1x64xf32>
    %103 = vector.broadcast %102 : vector<1x64xf32> to vector<16x64xf32>
    %104 = arith.addf %101, %103 : vector<16x64xf32>
    %cst_35 = arith.constant 0.000000e+00 : f32
    %105 = vector.broadcast %cst_35 : f32 to vector<16x64xf32>
    %106 = arith.maximumf %104, %105 : vector<16x64xf32>
    %c0_36 = arith.constant 0 : index
    %c0_37 = arith.constant 0 : index
    %107 = vector.load %arg18[%c0_36, %c0_37] : memref<16x320xf32, #tpu.memory_space<vmem>>, vector<16x64xf32>
    tpu.vector_store %arg18[%c0_36, %c0_37], %106 {strides = array<i32>} : memref<16x320xf32, #tpu.memory_space<vmem>>, vector<16x64xf32>,
    %c0_38 = arith.constant 0 : index
    %c0_39 = arith.constant 0 : index
    %108 = vector.load %arg18[%c0_38, %c0_39] : memref<16x320xf32, #tpu.memory_space<vmem>>, vector<16x64xf32>
    %c0_40 = arith.constant 0 : index
    %c0_41 = arith.constant 0 : index
    %109 = vector.load %arg8[%c0_40, %c0_41] : memref<64x256xf32, #tpu.memory_space<vmem>>, vector<64x256xf32>
    %cst_42 = arith.constant dense<0.000000e+00> : vector<16x256xf32>
    %110 = tpu.matmul %108, %109, %cst_42 {dimension_numbers = #tpu.dot_dimension_numbers<[1], [0], [0], [1], [0, 0, 1, 1], [], []>} : vector<16x64xf32>, vector<64x256xf32>, vector<16x256xf32> -> vector<16x256xf32>
    %c0_43 = arith.constant 0 : index
    %c0_44 = arith.constant 0 : index
    %111 = vector.load %arg9[%c0_43, %c0_44] : memref<256x8xf32, #tpu.memory_space<vmem>>, vector<256x8xf32>
    %cst_45 = arith.constant dense<0.000000e+00> : vector<16x8xf32>
    %112 = tpu.matmul %110, %111, %cst_45 {dimension_numbers = #tpu.dot_dimension_numbers<[1], [0], [0], [1], [0, 0, 1, 1], [], []>} : vector<16x256xf32>, vector<256x8xf32>, vector<16x8xf32> -> vector<16x8xf32>
    %c0_46 = arith.constant 0 : index
    %c0_47 = arith.constant 0 : index
    %113 = vector.load %arg10[%c0_46, %c0_47] : memref<8x256xf32, #tpu.memory_space<vmem>>, vector<8x256xf32>
    %cst_48 = arith.constant dense<0.000000e+00> : vector<8x16xf32>
    %114 = tpu.matmul %113, %110, %cst_48 {dimension_numbers = #tpu.dot_dimension_numbers<[1], [1], [0], [0], [0, 0, 1, 0], [], []>} : vector<8x256xf32>, vector<16x256xf32>, vector<8x16xf32> -> vector<8x16xf32>
    %c0_49 = arith.constant 0 : index
    %c0_50 = arith.constant 0 : index
    %115 = vector.load %arg1[%c0_49, %c0_50] : memref<16x16xbf16, #tpu.memory_space<vmem>>, vector<16x16xbf16>
    %cst_51 = arith.constant 0.000000e+00 : bf16
    %116 = vector.broadcast %cst_51 : bf16 to vector<16x16xbf16>
    %117 = arith.cmpf ogt, %115, %116 : vector<16x16xbf16>
    %cst_52 = arith.constant 0.000000e+00 : f32
    %cst_53 = arith.constant -1.000000e+30 : f32
    %118 = vector.broadcast %cst_52 : f32 to vector<16x16xf32>
    %119 = vector.broadcast %cst_53 : f32 to vector<16x16xf32>
    %120 = arith.select %117, %118, %119 : vector<16x16xi1>, vector<16x16xf32>
    %121 = vector.extract_strided_slice %112 {offsets = [0, 0], sizes = [16, 1], strides = [1, 1]} : vector<16x8xf32> to vector<16x1xf32>
    %122 = vector.extract_strided_slice %114 {offsets = [0, 0], sizes = [1, 16], strides = [1, 1]} : vector<8x16xf32> to vector<1x16xf32>
    %123 = vector.broadcast %121 : vector<16x1xf32> to vector<16x16xf32>
    %124 = vector.broadcast %122 : vector<1x16xf32> to vector<16x16xf32>
    %125 = arith.addf %123, %124 : vector<16x16xf32>
    %cst_54 = arith.constant 0.000000e+00 : f32
    %126 = vector.broadcast %cst_54 : f32 to vector<16x16xf32>
    %127 = arith.cmpf ogt, %125, %126 : vector<16x16xf32>
    %cst_55 = arith.constant 2.000000e-01 : f32
    %128 = vector.broadcast %cst_55 : f32 to vector<16x16xf32>
    %129 = arith.mulf %128, %125 : vector<16x16xf32>
    %130 = arith.select %127, %125, %129 : vector<16x16xi1>, vector<16x16xf32>
    %131 = arith.addf %130, %120 : vector<16x16xf32>
    %cst_56 = arith.constant dense<0xFF800000> : vector<16xf32>
    %132 = vector.multi_reduction <maximumf>, %131, %cst_56 [1] : vector<16x16xf32> to vector<16xf32>
    %133 = vector.shape_cast %132 : vector<16xf32> to vector<16x1xf32>
    %134 = vector.broadcast %133 : vector<16x1xf32> to vector<16x16xf32>
    %135 = arith.subf %131, %134 : vector<16x16xf32>
    %136 = math.exp %135 : vector<16x16xf32>
    %cst_57 = arith.constant dense<0.000000e+00> : vector<16xf32>
    %137 = vector.multi_reduction <add>, %136, %cst_57 [1] : vector<16x16xf32> to vector<16xf32>
    %138 = vector.shape_cast %137 : vector<16xf32> to vector<16x1xf32>
    %139 = tpu.reciprocal %138 {approx = true} : vector<16x1xf32> -> vector<16x1xf32>
    %140 = vector.broadcast %139 : vector<16x1xf32> to vector<16x16xf32>
    %141 = arith.mulf %136, %140 : vector<16x16xf32>
    %142 = vector.extract_strided_slice %112 {offsets = [0, 1], sizes = [16, 1], strides = [1, 1]} : vector<16x8xf32> to vector<16x1xf32>
    %143 = vector.extract_strided_slice %114 {offsets = [1, 0], sizes = [1, 16], strides = [1, 1]} : vector<8x16xf32> to vector<1x16xf32>
    %144 = vector.broadcast %142 : vector<16x1xf32> to vector<16x16xf32>
    %145 = vector.broadcast %143 : vector<1x16xf32> to vector<16x16xf32>
    %146 = arith.addf %144, %145 : vector<16x16xf32>
    %cst_58 = arith.constant 0.000000e+00 : f32
    %147 = vector.broadcast %cst_58 : f32 to vector<16x16xf32>
    %148 = arith.cmpf ogt, %146, %147 : vector<16x16xf32>
    %cst_59 = arith.constant 2.000000e-01 : f32
    %149 = vector.broadcast %cst_59 : f32 to vector<16x16xf32>
    %150 = arith.mulf %149, %146 : vector<16x16xf32>
    %151 = arith.select %148, %146, %150 : vector<16x16xi1>, vector<16x16xf32>
    %152 = arith.addf %151, %120 : vector<16x16xf32>
    %cst_60 = arith.constant dense<0xFF800000> : vector<16xf32>
    %153 = vector.multi_reduction <maximumf>, %152, %cst_60 [1] : vector<16x16xf32> to vector<16xf32>
    %154 = vector.shape_cast %153 : vector<16xf32> to vector<16x1xf32>
    %155 = vector.broadcast %154 : vector<16x1xf32> to vector<16x16xf32>
    %156 = arith.subf %152, %155 : vector<16x16xf32>
    %157 = math.exp %156 : vector<16x16xf32>
    %cst_61 = arith.constant dense<0.000000e+00> : vector<16xf32>
    %158 = vector.multi_reduction <add>, %157, %cst_61 [1] : vector<16x16xf32> to vector<16xf32>
    %159 = vector.shape_cast %158 : vector<16xf32> to vector<16x1xf32>
    %160 = tpu.reciprocal %159 {approx = true} : vector<16x1xf32> -> vector<16x1xf32>
    %161 = vector.broadcast %160 : vector<16x1xf32> to vector<16x16xf32>
    %162 = arith.mulf %157, %161 : vector<16x16xf32>
    %163 = vector.extract_strided_slice %112 {offsets = [0, 2], sizes = [16, 1], strides = [1, 1]} : vector<16x8xf32> to vector<16x1xf32>
    %164 = vector.extract_strided_slice %114 {offsets = [2, 0], sizes = [1, 16], strides = [1, 1]} : vector<8x16xf32> to vector<1x16xf32>
    %165 = vector.broadcast %163 : vector<16x1xf32> to vector<16x16xf32>
    %166 = vector.broadcast %164 : vector<1x16xf32> to vector<16x16xf32>
    %167 = arith.addf %165, %166 : vector<16x16xf32>
    %cst_62 = arith.constant 0.000000e+00 : f32
    %168 = vector.broadcast %cst_62 : f32 to vector<16x16xf32>
    %169 = arith.cmpf ogt, %167, %168 : vector<16x16xf32>
    %cst_63 = arith.constant 2.000000e-01 : f32
    %170 = vector.broadcast %cst_63 : f32 to vector<16x16xf32>
    %171 = arith.mulf %170, %167 : vector<16x16xf32>
    %172 = arith.select %169, %167, %171 : vector<16x16xi1>, vector<16x16xf32>
    %173 = arith.addf %172, %120 : vector<16x16xf32>
    %cst_64 = arith.constant dense<0xFF800000> : vector<16xf32>
    %174 = vector.multi_reduction <maximumf>, %173, %cst_64 [1] : vector<16x16xf32> to vector<16xf32>
    %175 = vector.shape_cast %174 : vector<16xf32> to vector<16x1xf32>
    %176 = vector.broadcast %175 : vector<16x1xf32> to vector<16x16xf32>
    %177 = arith.subf %173, %176 : vector<16x16xf32>
    %178 = math.exp %177 : vector<16x16xf32>
    %cst_65 = arith.constant dense<0.000000e+00> : vector<16xf32>
    %179 = vector.multi_reduction <add>, %178, %cst_65 [1] : vector<16x16xf32> to vector<16xf32>
    %180 = vector.shape_cast %179 : vector<16xf32> to vector<16x1xf32>
    %181 = tpu.reciprocal %180 {approx = true} : vector<16x1xf32> -> vector<16x1xf32>
    %182 = vector.broadcast %181 : vector<16x1xf32> to vector<16x16xf32>
    %183 = arith.mulf %178, %182 : vector<16x16xf32>
    %184 = vector.extract_strided_slice %112 {offsets = [0, 3], sizes = [16, 1], strides = [1, 1]} : vector<16x8xf32> to vector<16x1xf32>
    %185 = vector.extract_strided_slice %114 {offsets = [3, 0], sizes = [1, 16], strides = [1, 1]} : vector<8x16xf32> to vector<1x16xf32>
    %186 = vector.broadcast %184 : vector<16x1xf32> to vector<16x16xf32>
    %187 = vector.broadcast %185 : vector<1x16xf32> to vector<16x16xf32>
    %188 = arith.addf %186, %187 : vector<16x16xf32>
    %cst_66 = arith.constant 0.000000e+00 : f32
    %189 = vector.broadcast %cst_66 : f32 to vector<16x16xf32>
    %190 = arith.cmpf ogt, %188, %189 : vector<16x16xf32>
    %cst_67 = arith.constant 2.000000e-01 : f32
    %191 = vector.broadcast %cst_67 : f32 to vector<16x16xf32>
    %192 = arith.mulf %191, %188 : vector<16x16xf32>
    %193 = arith.select %190, %188, %192 : vector<16x16xi1>, vector<16x16xf32>
    %194 = arith.addf %193, %120 : vector<16x16xf32>
    %cst_68 = arith.constant dense<0xFF800000> : vector<16xf32>
    %195 = vector.multi_reduction <maximumf>, %194, %cst_68 [1] : vector<16x16xf32> to vector<16xf32>
    %196 = vector.shape_cast %195 : vector<16xf32> to vector<16x1xf32>
    %197 = vector.broadcast %196 : vector<16x1xf32> to vector<16x16xf32>
    %198 = arith.subf %194, %197 : vector<16x16xf32>
    %199 = math.exp %198 : vector<16x16xf32>
    %cst_69 = arith.constant dense<0.000000e+00> : vector<16xf32>
    %200 = vector.multi_reduction <add>, %199, %cst_69 [1] : vector<16x16xf32> to vector<16xf32>
    %201 = vector.shape_cast %200 : vector<16xf32> to vector<16x1xf32>
    %202 = tpu.reciprocal %201 {approx = true} : vector<16x1xf32> -> vector<16x1xf32>
    %203 = vector.broadcast %202 : vector<16x1xf32> to vector<16x16xf32>
    %204 = arith.mulf %199, %203 : vector<16x16xf32>
    %205 = vector.extract_strided_slice %112 {offsets = [0, 4], sizes = [16, 1], strides = [1, 1]} : vector<16x8xf32> to vector<16x1xf32>
    %206 = vector.extract_strided_slice %114 {offsets = [4, 0], sizes = [1, 16], strides = [1, 1]} : vector<8x16xf32> to vector<1x16xf32>
    %207 = vector.broadcast %205 : vector<16x1xf32> to vector<16x16xf32>
    %208 = vector.broadcast %206 : vector<1x16xf32> to vector<16x16xf32>
    %209 = arith.addf %207, %208 : vector<16x16xf32>
    %cst_70 = arith.constant 0.000000e+00 : f32
    %210 = vector.broadcast %cst_70 : f32 to vector<16x16xf32>
    %211 = arith.cmpf ogt, %209, %210 : vector<16x16xf32>
    %cst_71 = arith.constant 2.000000e-01 : f32
    %212 = vector.broadcast %cst_71 : f32 to vector<16x16xf32>
    %213 = arith.mulf %212, %209 : vector<16x16xf32>
    %214 = arith.select %211, %209, %213 : vector<16x16xi1>, vector<16x16xf32>
    %215 = arith.addf %214, %120 : vector<16x16xf32>
    %cst_72 = arith.constant dense<0xFF800000> : vector<16xf32>
    %216 = vector.multi_reduction <maximumf>, %215, %cst_72 [1] : vector<16x16xf32> to vector<16xf32>
    %217 = vector.shape_cast %216 : vector<16xf32> to vector<16x1xf32>
    %218 = vector.broadcast %217 : vector<16x1xf32> to vector<16x16xf32>
    %219 = arith.subf %215, %218 : vector<16x16xf32>
    %220 = math.exp %219 : vector<16x16xf32>
    %cst_73 = arith.constant dense<0.000000e+00> : vector<16xf32>
    %221 = vector.multi_reduction <add>, %220, %cst_73 [1] : vector<16x16xf32> to vector<16xf32>
    %222 = vector.shape_cast %221 : vector<16xf32> to vector<16x1xf32>
    %223 = tpu.reciprocal %222 {approx = true} : vector<16x1xf32> -> vector<16x1xf32>
    %224 = vector.broadcast %223 : vector<16x1xf32> to vector<16x16xf32>
    %225 = arith.mulf %220, %224 : vector<16x16xf32>
    %226 = vector.extract_strided_slice %112 {offsets = [0, 5], sizes = [16, 1], strides = [1, 1]} : vector<16x8xf32> to vector<16x1xf32>
    %227 = vector.extract_strided_slice %114 {offsets = [5, 0], sizes = [1, 16], strides = [1, 1]} : vector<8x16xf32> to vector<1x16xf32>
    %228 = vector.broadcast %226 : vector<16x1xf32> to vector<16x16xf32>
    %229 = vector.broadcast %227 : vector<1x16xf32> to vector<16x16xf32>
    %230 = arith.addf %228, %229 : vector<16x16xf32>
    %cst_74 = arith.constant 0.000000e+00 : f32
    %231 = vector.broadcast %cst_74 : f32 to vector<16x16xf32>
    %232 = arith.cmpf ogt, %230, %231 : vector<16x16xf32>
    %cst_75 = arith.constant 2.000000e-01 : f32
    %233 = vector.broadcast %cst_75 : f32 to vector<16x16xf32>
    %234 = arith.mulf %233, %230 : vector<16x16xf32>
    %235 = arith.select %232, %230, %234 : vector<16x16xi1>, vector<16x16xf32>
    %236 = arith.addf %235, %120 : vector<16x16xf32>
    %cst_76 = arith.constant dense<0xFF800000> : vector<16xf32>
    %237 = vector.multi_reduction <maximumf>, %236, %cst_76 [1] : vector<16x16xf32> to vector<16xf32>
    %238 = vector.shape_cast %237 : vector<16xf32> to vector<16x1xf32>
    %239 = vector.broadcast %238 : vector<16x1xf32> to vector<16x16xf32>
    %240 = arith.subf %236, %239 : vector<16x16xf32>
    %241 = math.exp %240 : vector<16x16xf32>
    %cst_77 = arith.constant dense<0.000000e+00> : vector<16xf32>
    %242 = vector.multi_reduction <add>, %241, %cst_77 [1] : vector<16x16xf32> to vector<16xf32>
    %243 = vector.shape_cast %242 : vector<16xf32> to vector<16x1xf32>
    %244 = tpu.reciprocal %243 {approx = true} : vector<16x1xf32> -> vector<16x1xf32>
    %245 = vector.broadcast %244 : vector<16x1xf32> to vector<16x16xf32>
    %246 = arith.mulf %241, %245 : vector<16x16xf32>
    %247 = vector.extract_strided_slice %112 {offsets = [0, 6], sizes = [16, 1], strides = [1, 1]} : vector<16x8xf32> to vector<16x1xf32>
    %248 = vector.extract_strided_slice %114 {offsets = [6, 0], sizes = [1, 16], strides = [1, 1]} : vector<8x16xf32> to vector<1x16xf32>
    %249 = vector.broadcast %247 : vector<16x1xf32> to vector<16x16xf32>
    %250 = vector.broadcast %248 : vector<1x16xf32> to vector<16x16xf32>
    %251 = arith.addf %249, %250 : vector<16x16xf32>
    %cst_78 = arith.constant 0.000000e+00 : f32
    %252 = vector.broadcast %cst_78 : f32 to vector<16x16xf32>
    %253 = arith.cmpf ogt, %251, %252 : vector<16x16xf32>
    %cst_79 = arith.constant 2.000000e-01 : f32
    %254 = vector.broadcast %cst_79 : f32 to vector<16x16xf32>
    %255 = arith.mulf %254, %251 : vector<16x16xf32>
    %256 = arith.select %253, %251, %255 : vector<16x16xi1>, vector<16x16xf32>
    %257 = arith.addf %256, %120 : vector<16x16xf32>
    %cst_80 = arith.constant dense<0xFF800000> : vector<16xf32>
    %258 = vector.multi_reduction <maximumf>, %257, %cst_80 [1] : vector<16x16xf32> to vector<16xf32>
    %259 = vector.shape_cast %258 : vector<16xf32> to vector<16x1xf32>
    %260 = vector.broadcast %259 : vector<16x1xf32> to vector<16x16xf32>
    %261 = arith.subf %257, %260 : vector<16x16xf32>
    %262 = math.exp %261 : vector<16x16xf32>
    %cst_81 = arith.constant dense<0.000000e+00> : vector<16xf32>
    %263 = vector.multi_reduction <add>, %262, %cst_81 [1] : vector<16x16xf32> to vector<16xf32>
    %264 = vector.shape_cast %263 : vector<16xf32> to vector<16x1xf32>
    %265 = tpu.reciprocal %264 {approx = true} : vector<16x1xf32> -> vector<16x1xf32>
    %266 = vector.broadcast %265 : vector<16x1xf32> to vector<16x16xf32>
    %267 = arith.mulf %262, %266 : vector<16x16xf32>
    %268 = vector.extract_strided_slice %112 {offsets = [0, 7], sizes = [16, 1], strides = [1, 1]} : vector<16x8xf32> to vector<16x1xf32>
    %269 = vector.extract_strided_slice %114 {offsets = [7, 0], sizes = [1, 16], strides = [1, 1]} : vector<8x16xf32> to vector<1x16xf32>
    %270 = vector.broadcast %268 : vector<16x1xf32> to vector<16x16xf32>
    %271 = vector.broadcast %269 : vector<1x16xf32> to vector<16x16xf32>
    %272 = arith.addf %270, %271 : vector<16x16xf32>
    %cst_82 = arith.constant 0.000000e+00 : f32
    %273 = vector.broadcast %cst_82 : f32 to vector<16x16xf32>
    %274 = arith.cmpf ogt, %272, %273 : vector<16x16xf32>
    %cst_83 = arith.constant 2.000000e-01 : f32
    %275 = vector.broadcast %cst_83 : f32 to vector<16x16xf32>
    %276 = arith.mulf %275, %272 : vector<16x16xf32>
    %277 = arith.select %274, %272, %276 : vector<16x16xi1>, vector<16x16xf32>
    %278 = arith.addf %277, %120 : vector<16x16xf32>
    %cst_84 = arith.constant dense<0xFF800000> : vector<16xf32>
    %279 = vector.multi_reduction <maximumf>, %278, %cst_84 [1] : vector<16x16xf32> to vector<16xf32>
    %280 = vector.shape_cast %279 : vector<16xf32> to vector<16x1xf32>
    %281 = vector.broadcast %280 : vector<16x1xf32> to vector<16x16xf32>
    %282 = arith.subf %278, %281 : vector<16x16xf32>
    %283 = math.exp %282 : vector<16x16xf32>
    %cst_85 = arith.constant dense<0.000000e+00> : vector<16xf32>
    %284 = vector.multi_reduction <add>, %283, %cst_85 [1] : vector<16x16xf32> to vector<16xf32>
    %285 = vector.shape_cast %284 : vector<16xf32> to vector<16x1xf32>
    %286 = tpu.reciprocal %285 {approx = true} : vector<16x1xf32> -> vector<16x1xf32>
    %287 = vector.broadcast %286 : vector<16x1xf32> to vector<16x16xf32>
    %288 = arith.mulf %283, %287 : vector<16x16xf32>
    %289 = tpu.concatenate %141, %162, %183, %204, %225, %246, %267, %288 in 1 : vector<16x16xf32>, vector<16x16xf32>, vector<16x16xf32>, vector<16x16xf32>, vector<16x16xf32>, vector<16x16xf32>, vector<16x16xf32>, vector<16x16xf32> -> vector<16x128xf32>
    %290 = tpu.concatenate %110, %110, %110, %110, %110, %110, %110, %110 in 0 : vector<16x256xf32>, vector<16x256xf32>, vector<16x256xf32>, vector<16x256xf32>, vector<16x256xf32>, vector<16x256xf32>, vector<16x256xf32>, vector<16x256xf32> -> vector<128x256xf32>
    %c0_86 = arith.constant 0 : index
    %c0_87 = arith.constant 0 : index
    %291 = vector.load %arg12[%c0_86, %c0_87] : memref<128x256xf32, #tpu.memory_space<vmem>>, vector<128x256xf32>
    %292 = arith.mulf %290, %291 : vector<128x256xf32>
    %cst_88 = arith.constant dense<0.000000e+00> : vector<16x256xf32>
    %293 = tpu.matmul %289, %292, %cst_88 {dimension_numbers = #tpu.dot_dimension_numbers<[1], [0], [0], [1], [0, 0, 1, 1], [], []>} : vector<16x128xf32>, vector<128x256xf32>, vector<16x256xf32> -> vector<16x256xf32>
    %c0_89 = arith.constant 0 : index
    %c0_90 = arith.constant 0 : index
    %294 = vector.load %arg11[%c0_89, %c0_90] : memref<1x256xf32, #tpu.memory_space<vmem>>, vector<1x256xf32>
    %295 = vector.broadcast %294 : vector<1x256xf32> to vector<16x256xf32>
    %296 = arith.addf %293, %295 : vector<16x256xf32>
    %cst_91 = arith.constant 0.000000e+00 : f32
    %297 = vector.broadcast %cst_91 : f32 to vector<16x256xf32>
    %298 = arith.maximumf %296, %297 : vector<16x256xf32>
    %c0_92 = arith.constant 0 : index
    %c64 = arith.constant 64 : index
    %299 = vector.load %arg18[%c0_92, %c64] : memref<16x320xf32, #tpu.memory_space<vmem>>, vector<16x256xf32>
    tpu.vector_store %arg18[%c0_92, %c64], %298 {strides = array<i32>} : memref<16x320xf32, #tpu.memory_space<vmem>>, vector<16x256xf32>,
    %c0_93 = arith.constant 0 : index
    %c0_94 = arith.constant 0 : index
    %300 = vector.load %arg2[%c0_93, %c0_94] : memref<2x16xf32, #tpu.memory_space<vmem>>, vector<2x16xf32>
    %c0_95 = arith.constant 0 : index
    %c0_96 = arith.constant 0 : index
    %301 = vector.load %arg18[%c0_95, %c0_96] : memref<16x320xf32, #tpu.memory_space<vmem>>, vector<16x320xf32>
    %cst_97 = arith.constant dense<0.000000e+00> : vector<2x320xf32>
    %302 = tpu.matmul %300, %301, %cst_97 {dimension_numbers = #tpu.dot_dimension_numbers<[1], [0], [0], [1], [0, 0, 1, 1], [], []>} : vector<2x16xf32>, vector<16x320xf32>, vector<2x320xf32> -> vector<2x320xf32>
    %c0_98 = arith.constant 0 : index
    %c0_99 = arith.constant 0 : index
    %303 = vector.load %arg13[%c0_98, %c0_99] : memref<320x128xf32, #tpu.memory_space<vmem>>, vector<320x128xf32>
    %cst_100 = arith.constant dense<0.000000e+00> : vector<2x128xf32>
    %304 = tpu.matmul %302, %303, %cst_100 {dimension_numbers = #tpu.dot_dimension_numbers<[1], [0], [0], [1], [0, 0, 1, 1], [], []>} : vector<2x320xf32>, vector<320x128xf32>, vector<2x128xf32> -> vector<2x128xf32>
    %c0_101 = arith.constant 0 : index
    %c0_102 = arith.constant 0 : index
    %305 = vector.load %arg14[%c0_101, %c0_102] : memref<1x128xf32, #tpu.memory_space<vmem>>, vector<1x128xf32>
    %306 = vector.broadcast %305 : vector<1x128xf32> to vector<2x128xf32>
    %307 = arith.addf %304, %306 : vector<2x128xf32>
    %cst_103 = arith.constant 0.000000e+00 : f32
    %308 = vector.broadcast %cst_103 : f32 to vector<2x128xf32>
    %309 = arith.maximumf %307, %308 : vector<2x128xf32>
    %c0_104 = arith.constant 0 : index
    %c0_105 = arith.constant 0 : index
    %310 = vector.load %arg15[%c0_104, %c0_105] : memref<128x1xf32, #tpu.memory_space<vmem>>, vector<128x1xf32>
    %cst_106 = arith.constant dense<0.000000e+00> : vector<2x1xf32>
    %311 = tpu.matmul %309, %310, %cst_106 {dimension_numbers = #tpu.dot_dimension_numbers<[1], [0], [0], [1], [0, 0, 1, 1], [], []>} : vector<2x128xf32>, vector<128x1xf32>, vector<2x1xf32> -> vector<2x1xf32>
    %c0_107 = arith.constant 0 : index
    %c0_108 = arith.constant 0 : index
    %312 = vector.load %arg16[%c0_107, %c0_108] : memref<1x1xf32, #tpu.memory_space<vmem>>, vector<1x1xf32>
    %313 = vector.broadcast %312 : vector<1x1xf32> to vector<2x1xf32>
    %314 = arith.addf %311, %313 : vector<2x1xf32>
    %c0_109 = arith.constant 0 : index
    %c0_110 = arith.constant 0 : index
    %315 = vector.load %arg17[%c0_109, %c0_110] : memref<2x1xf32, #tpu.memory_space<vmem>>, vector<2x1xf32>
    tpu.vector_store %arg17[%c0_109, %c0_110], %314 {strides = array<i32>} : memref<2x1xf32, #tpu.memory_space<vmem>>, vector<2x1xf32>,
    return
  }
}

</mosaic_0001>

<bundles_post_ra>
// kernel: tpu_custom_call.1
= control target key start
LH: loop header
LB: loop body
LE: loop exit
PB: predicated region body
PF: predicated region fallthrough
CT: control target
= control target key end

     0   :  { %s2598_s0 = inlined_call_operand.vmem [shape: f32[16,8], index: 0, kind: input, shape index: {}]   ;;  %s2599_s1 = inlined_call_operand.vmem [shape: bf16[16,16], index: 1, kind: input, shape index: {}]   ;;  %s2600_s2 = inlined_call_operand.hbm [shape: f32[2,16], index: 2, kind: input, shape index: {}]   ;;  %s2601_s3 = inlined_call_operand.hbm [shape: f32[8,64], index: 3, kind: input, shape index: {}]   ;;  %s2602_s4 = inlined_call_operand.vmem [shape: f32[64,4], index: 4, kind: input, shape index: {}]   ;;  %s2603_s5 = inlined_call_operand.vmem [shape: f32[4,64], index: 5, kind: input, shape index: {}]   ;;  %s2604_s6 = inlined_call_operand.vmem [shape: f32[1,64], index: 6, kind: input, shape index: {}]   ;;  %s2605_s7 = inlined_call_operand.hbm [shape: f32[64,64], index: 7, kind: input, shape index: {}]   ;;  %s2606_s8 = inlined_call_operand.vmem [shape: f32[64,256], index: 8, kind: input, shape index: {}]   ;;  %s2607_s9 = inlined_call_operand.vmem [shape: f32[256,8], index: 9, kind: input, shape index: {}]   ;;  %s2608_s10 = inlined_call_operand.vmem [shape: f32[8,256], index: 10, kind: input, shape index: {}]   ;;  %s2609_s11 = inlined_call_operand.vmem [shape: f32[1,256], index: 11, kind: input, shape index: {}]   ;;  %s2610_s12 = inlined_call_operand.hbm [shape: f32[128,256], index: 12, kind: input, shape index: {}]   ;;  %s2611_s13 = inlined_call_operand.vmem [shape: f32[320,128], index: 13, kind: input, shape index: {}]   ;;  %s2612_s14 = inlined_call_operand.vmem [shape: f32[1,128], index: 14, kind: input, shape index: {}]   ;;  %s2613_s15 = inlined_call_operand.vmem [shape: f32[128,1], index: 15, kind: input, shape index: {}]   ;;  %s2614_s16 = inlined_call_operand.<no memory space> [shape: f32[1,1], index: 16, kind: input, shape index: {}]   ;;  %s2615_s17 = inlined_call_operand.vmem [shape: f32[2,1], index: 17, kind: output, shape index: {}]  }
   0x1   :  { %2617 = sst [smem:[#allocation14_spill]] %s2598_s0  ;;  %v22_v0 = vstv %s2614_s16 }
   0x2   :  { %2618 = sst [smem:[#allocation15_spill]] %s2599_s1  ;;  %23 = vst [vmem:[#allocation3] sm:$0x1] %v22_v0 }
   0x3   :  { %24 = vsyncpa [#allocation5], 0 }
   0x4   :  { %25 = vsyncpa [#allocation7], 0  ;;  %s47_s28 = sshll.u32 %s2601_s3, 4  ;;  %s48_s28 = int_to_ptr.hbm [resolvable:$true] %s47_s28 }
   0x5   :  { %26 = vsyncpa [#allocation10], 0  ;;  %s1741_s29 = smov [#allocation6]   ;;  %s36_s19 = sshll.u32 %s2600_s2, 4  ;;  %s37_s19 = int_to_ptr.hbm [resolvable:$true] %s36_s19 }
   0x6   :  { %s49_s0 = sshll.u32 %s1741_s29, 4  ;;  %s1742_s1 = smov [#allocation4]   ;;  %s50_s0 = int_to_ptr.vmem [resolvable:$true] %s49_s0 }
   0x7   :  { %52 = dma.hbm_to_vmem [thread:$0]  %s48_s28, 128, %s50_s0, [#allocation7]  }
   0x8   :  { %s38_s16 = sshll.u32 %s1742_s1, 4  ;;  %s63_s22 = sshll.u32 %s2605_s7, 4  ;;  %s39_s16 = int_to_ptr.vmem [resolvable:$true] %s38_s16  ;;  %s64_s22 = int_to_ptr.hbm [resolvable:$true] %s63_s22 }
   0x9   :  { %41 = dma.hbm_to_vmem [thread:$0]  %s37_s19, 32, %s39_s16, [#allocation5]  }
   0xa   :  { %s1743_s3 = smov [#allocation8]   ;;  %s84_s26 = sshll.u32 %s2610_s12, 4  ;;  %s85_s26 = int_to_ptr.hbm [resolvable:$true] %s84_s26 }
   0xb   :  { %s65_s23 = sshll.u32 %s1743_s3, 4  ;;  %s1744_s27 = smov 128   ;;  %s66_s23 = int_to_ptr.vmem [resolvable:$true] %s65_s23 }
   0xc   :  { %s1745_s2 = smov 8   ;;  %s1746_s28 = smov [#allocation9]  }
   0xd   :  { %71 = dma.hbm_to_vmem [thread:$0]  %s64_s22, 1024, %s66_s23, [#allocation7], %s1744_s27, %s1744_s27, %s1745_s2  }
   0xe   :  { %s86_s29 = sshll.u32 %s1746_s28, 4  ;;  %s1747_s0 = smov 256   ;;  %s87_s29 = int_to_ptr.vmem [resolvable:$true] %s86_s29 }
   0xf   :  { %s1748_s30 = smov 16  }
  0x10   :  { %92 = dma.hbm_to_vmem [thread:$0]  %s85_s26, 4096, %s87_s29, [#allocation10], %s1747_s0, %s1747_s0, %s1748_s30  }
  0x11   :  { %1735 = dma.done.wait [#allocation5], 32  }
  0x12   :  { %1736 = vsyncadd [#allocation5], 4294967264 }
  0x13   :  { %1737 = dma.done.wait [#allocation7], 1152  }
  0x14   :  { %1738 = vsyncadd [#allocation7], 4294966144 }
  0x15   :  { %1739 = dma.done.wait [#allocation10], 4096  }
  0x16   :  { %1740 = vsyncadd [#allocation10], 4294963200  ;;  %vm120_vm0 = vcmask 64512   ;;  %v119_v1 = vld [vmem:[#allocation6] sm:$0xff]  ;;  %s2619_s18 = sld [smem:[#allocation14_spill]]  ;;  %v155_v5 = vld [vmem:[%s2602_s4 + $0x28] sm:$0xff] }
  0x17   :  { %142 = vmatpush.msra.mxu0 %v119_v1  ;;  %v157_v3 = vld [vmem:[%s2602_s4 + $0x38] sm:$0xff]  ;;  %v156_v4 = vld [vmem:[%s2602_s4 + $0x30] sm:$0xff]  ;;  %v154_v6 = vld [vmem:[%s2602_s4 + $0x20] sm:$0xff]  ;;  %v1749_v12 = vmov 3   ;;  %v1750_v13 = vmov 1   ;;  %vm158_vm1 = vcmask 523264  }
  0x18   :  { %173 = vmatpush.msra.mxu1 %v157_v3  ;;  %v153_v8 = vld [vmem:[%s2602_s4 + $0x18] sm:$0xff]  ;;  %v152_v9 = vld [vmem:[%s2602_s4 + $0x10] sm:$0xff]  ;;  %v151_v10 = vld [vmem:[%s2602_s4 + $0x8] sm:$0xff]  ;;  %1497 = vset.pattern.permute.xlu1 %v1749_v12  ;;  %v1751_v33 = vmov 2   ;;  %v1752_v36 = vmov 0   ;;  %s2620_s1 = sld [smem:[#allocation15_spill]] }
  0x19   :  { %v150_v11 = vld [vmem:[%s2602_s4] sm:$0xff]  ;;  %1495 = vset.pattern.permute.xlu0 %v1750_v13  ;;  %v426_v15 = vld [vmem:[#allocation8 + $0x38] sm:$0xff]  ;;  %v425_v17 = vld [vmem:[#allocation8 + $0x30] sm:$0xff]  ;;  %1499 = vset.pattern.permute.xlu2 %v1751_v33  ;;  %v1753_v50 = vmov -1e+30   ;;  %vm241_vm7 = vcmask 130048  }
  0x1a   :  { %174 = vmatpush.msra.mxu1 %v156_v4  ;;  %v424_v18 = vld [vmem:[#allocation8 + $0x28] sm:$0xff]  ;;  %v423_v22 = vld [vmem:[#allocation8 + $0x20] sm:$0xff]  ;;  %v422_v23 = vld [vmem:[#allocation8 + $0x18] sm:$0xff]  ;;  %s1754_s16 = smov 48   ;;  %s1755_s20 = smov 32   ;;  %vm413_vm13 = vcmask 261120  }
  0x1b   :  { %v188_v24 = vld [vmem:[%s2603_s5] sm:$0xf]  ;;  %v421_v27 = vld [vmem:[#allocation8 + $0x10] sm:$0xff]  ;;  %vm416_vm14 = vcmask 392192  }
  0x1c   :  { %v117_v2 = vld [vmem:[%s2619_s18] sm:$0xff]  ;;  %175 = vmatpush.msra.mxu1 %v155_v5  ;;  %v118_v7 = vld [vmem:[%s2619_s18 + $0x8] sm:$0xff] }
  0x1d   :  { %1447 = vmatmul.msk.f32.vlgmr.msra.gmra.mxu0 %vm120_vm0, %v117_v2  ;;  %v420_v28 = vld [vmem:[#allocation8 + $0x8] sm:$0xff]  ;;  %v419_v31 = vld [vmem:[#allocation8] sm:$0xff] }
  0x1e   :  { %176 = vmatpush.msra.mxu1 %v154_v6  ;;  %v1465_v39 = vld [vmem:[%s2620_s1] sm:$0xff]  }
  0x1f   :  { %v1466_v40 = vunpack.c.l.bf16 %v1465_v39  ;;  %v1471_v52 = vunpack.c.h.bf16 %v1465_v39 }
  0x20   :  { %177 = vmatpush.msra.mxu1 %v153_v8 }
  0x21   :  { %vm216_vm2 = vcmp.gt.f32.partialorder %v1466_v40, 0.0  ;;  %vm667_vm5 = vcmp.gt.f32.partialorder %v1471_v52, 0.0 }
  0x22   :  { %178 = vmatpush.msra.mxu1 %v152_v9  ;;  %v1929_v51 = vsel %vm216_vm2, 0.0, %v1753_v50  ;;  %v1936_v2 = vsel %vm667_vm5, 0.0, %v1753_v50 }
  0x24   :  { %179 = vmatpush.msra.mxu1 %v151_v10 }
  0x25   :  { %1448 = vmatmul.msk.f32.gmra.mxu0 %vm120_vm0, %v118_v7 }
  0x26   :  { %180 = vmatpush.msra.mxu1 %v150_v11 }
  0x9a   :  { %v144_v14 = vpop.f32.mrf.mxu0 }
  0x9b   :  { %1449 = vmatmul.msk.f32.vlgmr.msra.gmra.mxu1 %vm158_vm1, %v144_v14  ;;  %v433_v20 = vmul.f32 %v425_v17, %v144_v14  ;;  %v431_v25 = vmul.f32 %v423_v22, %v144_v14  ;;  %v429_v29 = vmul.f32 %v421_v27, %v144_v14  ;;  %v427_v32 = vmul.f32 %v419_v31, %v144_v14 }
  0xa2   :  { %v147_v16 = vpop.f32.mrf.mxu0 }
  0xa3   :  { %1450 = vmatmul.msk.f32.gmra.mxu1 %vm158_vm1, %v147_v16  ;;  %1451 = vmatpush.xpose.msk.msra.mxu2 %vm158_vm1, %v147_v16  ;;  %v434_v19 = vmul.f32 %v426_v15, %v147_v16  ;;  %v432_v21 = vmul.f32 %v424_v18, %v147_v16  ;;  %v430_v26 = vmul.f32 %v422_v23, %v147_v16 }
  0xa4   :  { %v428_v30 = vmul.f32 %v420_v28, %v147_v16 }
  0xa5   :  { %453 = vmatpush.msra.mxu3 %v434_v19 }
  0xa7   :  { %1452 = vmatpush.xpose.msk.msra.mxu2 %vm158_vm1, %v144_v14  ;;  %454 = vmatpush.msra.mxu3 %v433_v20 }
  0xa9   :  { %455 = vmatpush.msra.mxu3 %v432_v21 }
  0xaa   :  { %1453 = vmatmul.msk.f32.vlgmr.msra.gmra.mxu2 %vm158_vm1, %v188_v24 }
  0xab   :  { %456 = vmatpush.msra.mxu3 %v431_v25 }
  0xad   :  { %457 = vmatpush.msra.mxu3 %v430_v26 }
  0xaf   :  { %458 = vmatpush.msra.mxu3 %v429_v29 }
  0xb1   :  { %459 = vmatpush.msra.mxu3 %v428_v30 }
  0xb3   :  { %460 = vmatpush.msra.mxu3 %v427_v32 }
 0x118   :  { %v182_v34 = vpop.f32.mrf.mxu1 }
 0x119   :  { %347 = vperm.xlu1 %1497, %v182_v34   ;;  %265 = vperm.xlu0 %1495, %v182_v34  }
 0x120   :  { %v185_v35 = vpop.f32.mrf.mxu1 }
 0x121   :  { %1498 = vset.pattern.permute.xlu1 %v1750_v13  ;;  %1496 = vset.pattern.permute.xlu0 %v1751_v33 }
 0x122   :  { %310 = vperm.xlu2 %1499, %v185_v35   ;;  %306 = vperm.xlu0 %1496, %v182_v34  }
 0x123   :  { %269 = vperm.xlu1 %1498, %v185_v35  }
 0x12a   :  { %1500 = vset.pattern.permute.xlu2 %v1749_v12  ;;  %1505 = vset.pattern.permute.xlu0 %v1749_v12 }
 0x12b   :  { %351 = vperm.xlu2 %1500, %v185_v35   ;;  %1501 = vset.pattern.permute.xlu1 %v1752_v36 }
 0x12c   :  { %222 = vperm.xlu1 %1501, %v182_v34  }
 0x12d   :  { %v1921_v38 = vpop.f32.mrf.mxu2 }
 0x12e   :  { %v272_v42 = vperm.slane %v1921_v38, 1  ;;  %v313_v43 = vperm.slane %v1921_v38, 2  ;;  %v354_v44 = vperm.slane %v1921_v38, 3  ;;  %v230_v55 = vperm.slane %v1921_v38, 0 }
 0x133   :  { %1502 = vset.pattern.permute.xlu2 %v1752_v36 }
 0x134   :  { %227 = vperm.xlu2 %1502, %v185_v35   ;;  %1504 = vset.pattern.permute.xlu1 %v1751_v33 }
 0x13c   :  { %1503 = vset.pattern.permute.xlu2 %v1750_v13 }
 0x17c   :  { %v311_v37 = vpop.permute.xlu2 %310 }
 0x17d   :  { %v315_v49 = vadd.f32 %v313_v43, %v311_v37 }
 0x17f   :  { %v319_v58 = vmul.f32 0.2, %v315_v49  ;;  %vm317_vm6 = vcmp.gt.f32.partialorder %v315_v49, 0.0 }
 0x181   :  { %v321_v3 = vsel %vm317_vm6, %v315_v49, %v319_v58 }
 0x182   :  { %v323_v9 = vadd.f32 %v1936_v2, %v321_v3 }
 0x184   :  { %v327_v18 = vsel %vm241_vm7, %v323_v9, -inf }
 0x185   :  { %v352_v41 = vpop.permute.xlu2 %351 }
 0x186   :  { %v356_v4 = vadd.f32 %v354_v44, %v352_v41 }
 0x188   :  { %v360_v14 = vmul.f32 0.2, %v356_v4  ;;  %vm358_vm11 = vcmp.gt.f32.partialorder %v356_v4, 0.0 }
 0x18a   :  { %v362_v23 = vsel %vm358_vm11, %v356_v4, %v360_v14 }
 0x18b   :  { %v348_v45 = vpop.permute.xlu1 %347  ;;  %v266_v46 = vpop.permute.xlu0 %265  ;;  %v364_v27 = vadd.f32 %v1936_v2, %v362_v23 }
 0x18c   :  { %v355_v47 = vadd.f32 %v354_v44, %v348_v45  ;;  %v273_v48 = vadd.f32 %v272_v42, %v266_v46 }
 0x18d   :  { %v368_v31 = vsel %vm241_vm7, %v364_v27, -inf }
 0x18e   :  { %vm357_vm3 = vcmp.gt.f32.partialorder %v355_v47, 0.0  ;;  %v359_v53 = vmul.f32 0.2, %v355_v47  ;;  %vm275_vm4 = vcmp.gt.f32.partialorder %v273_v48, 0.0  ;;  %v277_v54 = vmul.f32 0.2, %v273_v48  ;;  %v228_v59 = vpop.permute.xlu2 %227 }
 0x18f   :  { %v232_v0 = vadd.f32 %v230_v55, %v228_v59 }
 0x190   :  { %v279_v56 = vsel %vm275_vm4, %v273_v48, %v277_v54  ;;  %v361_v57 = vsel %vm357_vm3, %v355_v47, %v359_v53 }
 0x191   :  { %v281_v60 = vadd.f32 %v279_v56, %v1929_v51  ;;  %v363_v61 = vadd.f32 %v361_v57, %v1929_v51  ;;  %v236_v10 = vmul.f32 0.2, %v232_v0  ;;  %vm234_vm10 = vcmp.gt.f32.partialorder %v232_v0, 0.0 }
 0x193   :  { %v283_v62 = vsel %vm241_vm7, %v281_v60, -inf  ;;  %v365_v63 = vsel %vm241_vm7, %v363_v61, -inf  ;;  %v238_v21 = vsel %vm234_vm10, %v232_v0, %v236_v10 }
 0x194   :  { %v307_v1 = vpop.permute.xlu0 %306  ;;  %284 = vmax.xlane.f32.xlu0 %v283_v62  ;;  %366 = vmax.xlane.f32.xlu2 %v365_v63  ;;  %v240_v26 = vadd.f32 %v1936_v2, %v238_v21 }
 0x195   :  { %v314_v5 = vadd.f32 %v313_v43, %v307_v1  ;;  %v270_v6 = vpop.permute.xlu1 %269 }
 0x196   :  { %v274_v7 = vadd.f32 %v272_v42, %v270_v6  ;;  %v245_v29 = vsel %vm241_vm7, %v240_v26, -inf }
 0x197   :  { %vm316_vm8 = vcmp.gt.f32.partialorder %v314_v5, 0.0  ;;  %v318_v8 = vmul.f32 0.2, %v314_v5 }
 0x198   :  { %vm276_vm9 = vcmp.gt.f32.partialorder %v274_v7, 0.0  ;;  %v278_v11 = vmul.f32 0.2, %v274_v7 }
 0x199   :  { %v320_v15 = vsel %vm316_vm8, %v314_v5, %v318_v8 }
 0x19a   :  { %v322_v16 = vadd.f32 %v320_v15, %v1929_v51  ;;  %v280_v17 = vsel %vm276_vm9, %v274_v7, %v278_v11 }
 0x19b   :  { %v282_v19 = vadd.f32 %v1936_v2, %v280_v17 }
 0x19c   :  { %328 = vmax.xlane.f32.xlu0 %v327_v18  ;;  %v324_v20 = vsel %vm241_vm7, %v322_v16, -inf }
 0x19d   :  { %325 = vmax.xlane.f32.xlu1 %v324_v20  ;;  %v286_v22 = vsel %vm241_vm7, %v282_v19, -inf }
 0x19e   :  { %287 = vmax.xlane.f32.xlu2 %v286_v22  ;;  %v223_v24 = vpop.permute.xlu1 %222 }
 0x19f   :  { %v231_v25 = vadd.f32 %v230_v55, %v223_v24 }
 0x1a1   :  { %vm233_vm12 = vcmp.gt.f32.partialorder %v231_v25, 0.0  ;;  %v235_v28 = vmul.f32 0.2, %v231_v25 }
 0x1a3   :  { %v237_v30 = vsel %vm233_vm12, %v231_v25, %v235_v28 }
 0x1a4   :  { %246 = vmax.xlane.f32.xlu0 %v245_v29  ;;  %v239_v32 = vadd.f32 %v237_v30, %v1929_v51 }
 0x1a5   :  { %369 = vmax.xlane.f32.xlu1 %v368_v31 }
 0x1a6   :  { %v242_v34 = vsel %vm241_vm7, %v239_v32, -inf }
 0x1a7   :  { %243 = vmax.xlane.f32.xlu2 %v242_v34 }
 0x207   :  { %v285_v35 = vpop.xlane.xlu0 %284  ;;  %v367_v37 = vpop.xlane.xlu2 %366 }
 0x208   :  { %v289_v38 = vsub.f32 %v281_v60, %v285_v35  ;;  %v371_v39 = vsub.f32 %v363_v61, %v367_v37 }
 0x20a   :  { %v291_v40 = vmul.f32 1.442695, %v289_v38  ;;  %v373_v41 = vmul.f32 1.442695, %v371_v39  ;;  %v488_v39 = vld [vmem:[%s2606_s8 + $0x70] sm:$0xff] }
 0x20b   :  { %504 = vmatpush.msrb.mxu0 %v488_v39  ;;  %v563_v39 = vld [vmem:[%s2607_s9 + $0xa8] sm:$0xff] }
 0x20c   :  { %1543 = vpow2.f32 %v291_v40  ;;  %v489_v40 = vld [vmem:[%s2606_s8 + $0x78] sm:$0xff] }
 0x20d   :  { %1545 = vpow2.f32 %v373_v41  ;;  %527 = vmatpush.msrb.mxu2 %v489_v40 }
 0x20f   :  { %v329_v42 = vpop.xlane.xlu0 %328 }
 0x210   :  { %v326_v43 = vpop.xlane.xlu1 %325  ;;  %v331_v48 = vsub.f32 %v323_v9, %v329_v42 }
 0x211   :  { %v288_v44 = vpop.xlane.xlu2 %287  ;;  %v330_v45 = vsub.f32 %v322_v16, %v326_v43 }
 0x212   :  { %v1544_v46 = vpop.eup %1543  ;;  %v334_v53 = vmul.f32 1.442695, %v331_v48  ;;  %v290_v63 = vsub.f32 %v282_v19, %v288_v44 }
 0x213   :  { %v1546_v47 = vpop.eup %1545  ;;  %v332_v49 = vmul.f32 1.442695, %v330_v45  ;;  %v295_v50 = vsel %vm241_vm7, %v1544_v46, 0.0 }
 0x214   :  { %v377_v52 = vsel %vm241_vm7, %v1546_v47, 0.0  ;;  %296 = vadd.xlane.f32.xlu1 %v295_v50  ;;  %v293_v4 = vmul.f32 1.442695, %v290_v63  ;;  %v480_v63 = vld [vmem:[%s2606_s8 + $0x30] sm:$0xff] }
 0x215   :  { %1547 = vpow2.f32 %v332_v49  ;;  %378 = vadd.xlane.f32.xlu0 %v377_v52 }
 0x216   :  { %1549 = vpow2.f32 %v334_v53 }
 0x217   :  { %v247_v54 = vpop.xlane.xlu0 %246 }
 0x218   :  { %v370_v55 = vpop.xlane.xlu1 %369  ;;  %v249_v59 = vsub.f32 %v240_v26, %v247_v54 }
 0x219   :  { %v372_v56 = vsub.f32 %v364_v27, %v370_v55 }
 0x21a   :  { %v244_v57 = vpop.xlane.xlu2 %243  ;;  %v252_v1 = vmul.f32 1.442695, %v249_v59  ;;  %v484_v59 = vld [vmem:[%s2606_s8 + $0x50] sm:$0xff] }
 0x21b   :  { %v1548_v58 = vpop.eup %1547  ;;  %v375_v60 = vmul.f32 1.442695, %v372_v56  ;;  %v248_v61 = vsub.f32 %v239_v32, %v244_v57  ;;  %v486_v57 = vld [vmem:[%s2606_s8 + $0x60] sm:$0xff] }
 0x21c   :  { %v336_v62 = vsel %vm241_vm7, %v1548_v58, 0.0  ;;  %v1550_v3 = vpop.eup %1549  ;;  %505 = vmatpush.msrb.mxu0 %v486_v57  ;;  %v1103_v57 = vld [vmem:[#allocation9 + $0xf0] sm:$0xff] }
 0x21d   :  { %1551 = vpow2.f32 %v375_v60  ;;  %v250_v0 = vmul.f32 1.442695, %v248_v61  ;;  %337 = vadd.xlane.f32.xlu2 %v336_v62  ;;  %v339_v6 = vsel %vm241_vm7, %v1550_v3, 0.0  ;;  %v485_v60 = vld [vmem:[%s2606_s8 + $0x58] sm:$0xff]  ;;  %v482_v61 = vld [vmem:[%s2606_s8 + $0x40] sm:$0xff]  ;;  %v483_v62 = vld [vmem:[%s2606_s8 + $0x48] sm:$0xff] }
 0x21e   :  { %506 = vmatpush.msrb.mxu0 %v484_v59 }
 0x21f   :  { %1553 = vpow2.f32 %v250_v0  ;;  %v481_v0 = vld [vmem:[%s2606_s8 + $0x38] sm:$0xff] }
 0x220   :  { %1555 = vpow2.f32 %v252_v1  ;;  %507 = vmatpush.msrb.mxu0 %v482_v61  ;;  %v478_v1 = vld [vmem:[%s2606_s8 + $0x20] sm:$0xff]  ;;  %v1099_v61 = vld [vmem:[#allocation9 + $0xd0] sm:$0xff] }
 0x221   :  { %1557 = vpow2.f32 %v293_v4  ;;  %v476_v4 = vld [vmem:[%s2606_s8 + $0x10] sm:$0xff] }
 0x222   :  { %508 = vmatpush.msrb.mxu0 %v480_v63 }
 0x223   :  { %v1552_v5 = vpop.eup %1551 }
 0x224   :  { %v380_v7 = vsel %vm241_vm7, %v1552_v5, 0.0  ;;  %509 = vmatpush.msrb.mxu0 %v478_v1 }
 0x225   :  { %v1554_v8 = vpop.eup %1553  ;;  %340 = vadd.xlane.f32.xlu2 %v339_v6  ;;  %381 = vadd.xlane.f32.xlu0 %v380_v7  ;;  %v474_v6 = vld [vmem:[%s2606_s8] sm:$0xff]  ;;  %v475_v7 = vld [vmem:[%s2606_s8 + $0x8] sm:$0xff] }
 0x226   :  { %v254_v9 = vsel %vm241_vm7, %v1554_v8, 0.0  ;;  %v1556_v10 = vpop.eup %1555  ;;  %510 = vmatpush.msrb.mxu0 %v476_v4  ;;  %v620_v4 = vld [vmem:[%s2608_s10] sm:$0xff] }
 0x227   :  { %255 = vadd.xlane.f32.xlu1 %v254_v9  ;;  %v1558_v11 = vpop.eup %1557  ;;  %v257_v14 = vsel %vm241_vm7, %v1556_v10, 0.0 }
 0x228   :  { %v298_v15 = vsel %vm241_vm7, %v1558_v11, 0.0  ;;  %511 = vmatpush.msrb.mxu0 %v474_v6  ;;  %v1100_v6 = vld [vmem:[#allocation9 + $0xd8] sm:$0xff] }
 0x22d   :  { %258 = vadd.xlane.f32.xlu2 %v257_v14  ;;  %v557_v14 = vld [vmem:[%s2607_s9 + $0x78] sm:$0xff] }
 0x22e   :  { %574 = vmatpush.msrb.mxu1 %v557_v14  ;;  %v1093_v14 = vld [vmem:[#allocation9 + $0xa0] sm:$0xff] }
 0x22f   :  { %299 = vadd.xlane.f32.xlu1 %v298_v15  ;;  %v556_v15 = vld [vmem:[%s2607_s9 + $0x70] sm:$0xff] }
 0x230   :  { %575 = vmatpush.msrb.mxu1 %v556_v15  ;;  %v621_v15 = vld [vmem:[%s2608_s10 + $0x8] sm:$0xff]  ;;  %s1760_s10 = smov 64  }
 0x287   :  { %v297_v16 = vpop.xlane.xlu1 %296 }
 0x288   :  { %v379_v17 = vpop.xlane.xlu0 %378  ;;  %1559 = vrcp.f32 %v297_v16  ;;  %v573_v16 = vld [vmem:[%s2607_s9 + $0xf8] sm:$0xff] }
 0x289   :  { %1561 = vrcp.f32 %v379_v17  ;;  %v555_v17 = vld [vmem:[%s2607_s9 + $0x68] sm:$0xff]  ;;  %597 = vmatpush.msrb.mxu3 %v573_v16 }
 0x28a   :  { %576 = vmatpush.msrb.mxu1 %v555_v17  ;;  %v1096_v17 = vld [vmem:[#allocation9 + $0xb8] sm:$0xff] }
 0x28e   :  { %v1560_v18 = vpop.eup %1559 }
 0x28f   :  { %v1562_v19 = vpop.eup %1561  ;;  %v303_v20 = vmul.f32 %v1560_v18, %v1544_v46  ;;  %v572_v18 = vld [vmem:[%s2607_s9 + $0xf0] sm:$0xff] }
 0x290   :  { %v338_v21 = vpop.xlane.xlu2 %337  ;;  %v385_v22 = vmul.f32 %v1562_v19, %v1546_v47  ;;  %v571_v19 = vld [vmem:[%s2607_s9 + $0xe8] sm:$0xff]  ;;  %598 = vmatpush.msrb.mxu3 %v572_v18 }
 0x291   :  { %1563 = vrcp.f32 %v338_v21  ;;  %389 = vrot.lane.b32.xlu0 %v303_v20, %s1748_s30  ;;  %v554_v20 = vld [vmem:[%s2607_s9 + $0x60] sm:$0xff] }
 0x292   :  { %405 = vrot.lane.b32.xlu2 %v385_v22, %s1754_s16  ;;  %v570_v21 = vld [vmem:[%s2607_s9 + $0xe0] sm:$0xff]  ;;  %599 = vmatpush.msrb.mxu3 %v571_v19  ;;  %v1091_v19 = vld [vmem:[#allocation9 + $0x90] sm:$0xff] }
 0x293   :  { %577 = vmatpush.msrb.mxu1 %v554_v20 }
 0x294   :  { %600 = vmatpush.msrb.mxu3 %v570_v21  ;;  %v1094_v21 = vld [vmem:[#allocation9 + $0xa8] sm:$0xff] }
 0x297   :  { %v1564_v23 = vpop.eup %1563 }
 0x298   :  { %v341_v24 = vpop.xlane.xlu2 %340  ;;  %v344_v25 = vmul.f32 %v1564_v23, %v1548_v58  ;;  %v382_v30 = vpop.xlane.xlu0 %381  ;;  %v487_v58 = vld [vmem:[%s2606_s8 + $0x68] sm:$0xff]  ;;  %v553_v23 = vld [vmem:[%s2607_s9 + $0x58] sm:$0xff] }
 0x299   :  { %1565 = vrcp.f32 %v341_v24  ;;  %528 = vmatpush.msrb.mxu2 %v487_v58  ;;  %v569_v24 = vld [vmem:[%s2607_s9 + $0xd8] sm:$0xff]  ;;  %578 = vmatpush.msrb.mxu1 %v553_v23 }
 0x29a   :  { %v256_v26 = vpop.xlane.xlu1 %255  ;;  %397 = vrot.lane.b32.xlu1 %v344_v25, %s1755_s20  ;;  %v552_v25 = vld [vmem:[%s2607_s9 + $0x50] sm:$0xff]  ;;  %601 = vmatpush.msrb.mxu3 %v569_v24  ;;  %v1101_v58 = vld [vmem:[#allocation9 + $0xe0] sm:$0xff] }
 0x29b   :  { %529 = vmatpush.msrb.mxu2 %v485_v60  ;;  %579 = vmatpush.msrb.mxu1 %v552_v25  ;;  %v1104_v60 = vld [vmem:[#allocation9 + $0xf8] sm:$0xff]  ;;  %v1089_v23 = vld [vmem:[#allocation9 + $0x80] sm:$0xff] }
 0x29c   :  { %v1092_v25 = vld [vmem:[#allocation9 + $0x98] sm:$0xff] }
 0x29d   :  { %530 = vmatpush.msrb.mxu2 %v483_v62 }
 0x29f   :  { %v1566_v27 = vpop.eup %1565  ;;  %531 = vmatpush.msrb.mxu2 %v481_v0  ;;  %v1102_v0 = vld [vmem:[#allocation9 + $0xe8] sm:$0xff] }
 0x2a0   :  { %v345_v28 = vmul.f32 %v1566_v27, %v1550_v3  ;;  %v259_v37 = vpop.xlane.xlu2 %258  ;;  %v479_v3 = vld [vmem:[%s2606_s8 + $0x28] sm:$0xff] }
 0x2a1   :  { %532 = vmatpush.msrb.mxu2 %v479_v3  ;;  %v551_v27 = vld [vmem:[%s2607_s9 + $0x48] sm:$0xff]  ;;  %v1097_v3 = vld [vmem:[#allocation9 + $0xc0] sm:$0xff] }
 0x2a2   :  { %v300_v29 = vpop.xlane.xlu1 %299  ;;  %399 = vrot.lane.b32.xlu1 %v345_v28, %s1755_s20  ;;  %v567_v28 = vld [vmem:[%s2607_s9 + $0xc8] sm:$0xff]  ;;  %580 = vmatpush.msrb.mxu1 %v551_v27 }
 0x2a3   :  { %1567 = vrcp.f32 %v300_v29  ;;  %v550_v29 = vld [vmem:[%s2607_s9 + $0x40] sm:$0xff]  ;;  %v1087_v27 = vld [vmem:[#allocation9 + $0x70] sm:$0xff] }
 0x2a4   :  { %1569 = vrcp.f32 %v382_v30  ;;  %v566_v30 = vld [vmem:[%s2607_s9 + $0xc0] sm:$0xff]  ;;  %581 = vmatpush.msrb.mxu1 %v550_v29 }
 0x2a5   :  { %1571 = vrcp.f32 %v256_v26  ;;  %v568_v26 = vld [vmem:[%s2607_s9 + $0xd0] sm:$0xff]  ;;  %v1090_v29 = vld [vmem:[#allocation9 + $0x88] sm:$0xff] }
 0x2a6   :  { %1573 = vrcp.f32 %v259_v37  ;;  %602 = vmatpush.msrb.mxu3 %v568_v26 }
 0x2a8   :  { %603 = vmatpush.msrb.mxu3 %v567_v28 }
 0x2a9   :  { %v1568_v31 = vpop.eup %1567 }
 0x2aa   :  { %v304_v32 = vmul.f32 %v1568_v31, %v1558_v11  ;;  %v1570_v34 = vpop.eup %1569  ;;  %v549_v31 = vld [vmem:[%s2607_s9 + $0x38] sm:$0xff]  ;;  %604 = vmatpush.msrb.mxu3 %v566_v30 }
 0x2ab   :  { %v386_v35 = vmul.f32 %v1570_v34, %v1552_v5  ;;  %v1572_v38 = vpop.eup %1571  ;;  %v477_v5 = vld [vmem:[%s2606_s8 + $0x18] sm:$0xff]  ;;  %v548_v34 = vld [vmem:[%s2607_s9 + $0x30] sm:$0xff]  ;;  %582 = vmatpush.msrb.mxu1 %v549_v31  ;;  %s1762_s8 = smov 96  }
 0x2ac   :  { %391 = vrot.lane.b32.xlu0 %v304_v32, %s1748_s30  ;;  %v262_v42 = vmul.f32 %v1572_v38, %v1554_v8  ;;  %v1574_v48 = vpop.eup %1573  ;;  %533 = vmatpush.msrb.mxu2 %v477_v5  ;;  %v1540_v8 = vld [vmem:[%s2604_s6] ss:$0 sm:$0xff]  ;;  %v565_v32 = vld [vmem:[%s2607_s9 + $0xb8] sm:$0xff]  ;;  %v547_v38 = vld [vmem:[%s2607_s9 + $0x28] sm:$0xff] }
 0x2ad   :  { %v263_v50 = vmul.f32 %v1574_v48, %v1556_v10  ;;  %605 = vmatpush.msrb.mxu3 %v565_v32  ;;  %583 = vmatpush.msrb.mxu1 %v548_v34  ;;  %v542_v48 = vld [vmem:[%s2607_s9] sm:$0xff]  ;;  %v1088_v34 = vld [vmem:[#allocation9 + $0x78] sm:$0xff] }
 0x2ae   :  { %534 = vmatpush.msrb.mxu2 %v475_v7  ;;  %v1085_v31 = vld [vmem:[#allocation9 + $0x60] sm:$0xff] }
 0x2af   :  { %584 = vmatpush.msrb.mxu1 %v547_v38 }
 0x2b4   :  { %407 = vrot.lane.b32.xlu0 %v386_v35, %s1754_s16  ;;  %v564_v35 = vld [vmem:[%s2607_s9 + $0xb0] sm:$0xff] }
 0x2b5   :  { %606 = vmatpush.msrb.mxu3 %v564_v35 }
 0x2b7   :  { %607 = vmatpush.msrb.mxu3 %v563_v39  ;;  %v1086_v39 = vld [vmem:[#allocation9 + $0x68] sm:$0xff] }
 0x2ec   :  { %v406_v45 = vpop.permute.xlu2 %405 }
 0x303   :  { %v390_v41 = vpop.permute.xlu0 %389 }
 0x304   :  { %v411_v43 = vsel %vm241_vm7, %v262_v42, %v390_v41  ;;  %v546_v41 = vld [vmem:[%s2607_s9 + $0x20] sm:$0xff] }
 0x305   :  { %v562_v42 = vld [vmem:[%s2607_s9 + $0xa0] sm:$0xff]  ;;  %585 = vmatpush.msrb.mxu1 %v546_v41 }
 0x306   :  { %608 = vmatpush.msrb.mxu3 %v562_v42  ;;  %v1081_v41 = vld [vmem:[#allocation9 + $0x40] sm:$0xff] }
 0x30c   :  { %v398_v44 = vpop.permute.xlu1 %397 }
 0x30d   :  { %v414_v46 = vsel %vm413_vm13, %v411_v43, %v398_v44  ;;  %v545_v44 = vld [vmem:[%s2607_s9 + $0x18] sm:$0xff] }
 0x30e   :  { %v417_v47 = vsel %vm416_vm14, %v414_v46, %v406_v45  ;;  %v544_v45 = vld [vmem:[%s2607_s9 + $0x10] sm:$0xff]  ;;  %586 = vmatpush.msrb.mxu1 %v545_v44  ;;  %v543_v46 = vld [vmem:[%s2607_s9 + $0x8] sm:$0xff] }
 0x30f   :  { %1454 = vmatmul.msk.f32.vlgmr.msra.gmra.mxu3 %vm158_vm1, %v417_v47 }
 0x310   :  { %587 = vmatpush.msrb.mxu1 %v544_v45  ;;  %v1079_v45 = vld [vmem:[#allocation9 + $0x30] sm:$0xff] }
 0x312   :  { %588 = vmatpush.msrb.mxu1 %v543_v46 }
 0x314   :  { %v400_v53 = vpop.permute.xlu1 %399  ;;  %589 = vmatpush.msrb.mxu1 %v542_v48 }
 0x31e   :  { %v392_v49 = vpop.permute.xlu0 %391 }
 0x31f   :  { %v412_v52 = vsel %vm241_vm7, %v263_v50, %v392_v49  ;;  %v561_v49 = vld [vmem:[%s2607_s9 + $0x98] sm:$0xff]  ;;  %v560_v50 = vld [vmem:[%s2607_s9 + $0x90] sm:$0xff] }
 0x320   :  { %v415_v55 = vsel %vm413_vm13, %v412_v52, %v400_v53  ;;  %609 = vmatpush.msrb.mxu3 %v561_v49  ;;  %v559_v52 = vld [vmem:[%s2607_s9 + $0x88] sm:$0xff]  ;;  %v558_v53 = vld [vmem:[%s2607_s9 + $0x80] sm:$0xff] }
 0x321   :  { %v1077_v49 = vld [vmem:[#allocation9 + $0x20] sm:$0xff] }
 0x322   :  { %610 = vmatpush.msrb.mxu3 %v560_v50 }
 0x324   :  { %611 = vmatpush.msrb.mxu3 %v559_v52  ;;  %v1080_v52 = vld [vmem:[#allocation9 + $0x38] sm:$0xff] }
 0x326   :  { %v408_v54 = vpop.permute.xlu0 %407  ;;  %612 = vmatpush.msrb.mxu3 %v558_v53 }
 0x327   :  { %v418_v56 = vsel %vm416_vm14, %v415_v55, %v408_v54 }
 0x328   :  { %1455 = vmatmul.msk.f32.gmra.mxu3 %vm158_vm1, %v418_v56 }
 0x392   :  { %v462_v9 = vpop.f32.mrf.mxu3 }
 0x393   :  { %v463_v10 = vadd.f32 %v1540_v8, %v462_v9 }
 0x395   :  { %v468_v11 = vmax.f32 %v463_v10, 0.0  ;;  %v1098_v10 = vld [vmem:[#allocation9 + $0xc8] sm:$0xff] }
 0x397   :  { %470 = vst.msk [vmem:[#allocation2] sm:$0xff] %vm158_vm1, %v468_v11 }
 0x39e   :  { %v472_v22 = vld [vmem:[#allocation2] sm:$0xff] }
 0x39f   :  { %1456 = vmatmul.msk.f32.vlgmr.msrb.gmra.mxu0 %vm158_vm1, %v472_v22  ;;  %1458 = vmatmul.msk.f32.vlgmr.msrb.gmra.mxu2 %vm158_vm1, %v472_v22 }
 0x3ab   :  { %v465_v37 = vpop.f32.mrf.mxu3 }
 0x3ac   :  { %v466_v40 = vadd.f32 %v1540_v8, %v465_v37  ;;  %v1095_v8 = vld [vmem:[#allocation9 + $0xb0] sm:$0xff] }
 0x3ad   :  { %v1083_v37 = vld [vmem:[#allocation9 + $0x50] sm:$0xff] }
 0x3ae   :  { %v469_v43 = vmax.f32 %v466_v40, 0.0 }
 0x3b0   :  { %471 = vst.msk [vmem:[#allocation2 + $0x18] sm:$0xff] %vm158_vm1, %v469_v43  ;;  %v1084_v43 = vld [vmem:[#allocation9 + $0x58] sm:$0xff] }
 0x3b7   :  { %v473_v47 = vld [vmem:[#allocation2 + $0x18] sm:$0xff] }
 0x3b8   :  { %1457 = vmatmul.msk.f32.gmra.mxu0 %vm158_vm1, %v473_v47  ;;  %1459 = vmatmul.msk.f32.gmra.mxu2 %vm158_vm1, %v473_v47  ;;  %v1082_v47 = vld [vmem:[#allocation9 + $0x48] sm:$0xff] }
 0x41c   :  { %v2125_v54 = vpop.f32.mrf.mxu0 }
 0x41d   :  { %590 = vmatmul.f32.vlgmr.msrb.gmra.mxu1 %v2125_v54  ;;  %v1133_v63 = vmul.f32 %v1101_v58, %v2125_v54  ;;  %v1129_v9 = vmul.f32 %v1097_v3, %v2125_v54  ;;  %v1125_v20 = vmul.f32 %v1093_v14, %v2125_v54  ;;  %v1121_v28 = vmul.f32 %v1089_v23, %v2125_v54 }
 0x41e   :  { %v1117_v38 = vmul.f32 %v1085_v31, %v2125_v54  ;;  %v1113_v46 = vmul.f32 %v1081_v41, %v2125_v54  ;;  %v1109_v58 = vmul.f32 %v1077_v49, %v2125_v54 }
 0x422   :  { %v2128_v55 = vpop.f32.mrf.mxu2 }
 0x423   :  { %613 = vmatmul.f32.vlgmr.msrb.gmra.mxu3 %v2128_v55  ;;  %v1134_v7 = vmul.f32 %v1102_v0, %v2128_v55  ;;  %v1130_v18 = vmul.f32 %v1098_v10, %v2128_v55  ;;  %v1126_v26 = vmul.f32 %v1094_v21, %v2128_v55  ;;  %v1122_v35 = vmul.f32 %v1090_v29, %v2128_v55  ;;  %v1076_v0 = vld [vmem:[#allocation9 + $0x18] sm:$0xff] }
 0x424   :  { %v1118_v44 = vmul.f32 %v1086_v39, %v2128_v55  ;;  %v1114_v53 = vmul.f32 %v1082_v47, %v2128_v55  ;;  %v1759_v10 = vmov 6  }
 0x435   :  { %v2131_v56 = vpop.f32.mrf.mxu0 }
 0x436   :  { %593 = vmatmul.f32.gmra.mxu1 %v2131_v56  ;;  %636 = vmatpush.xpose.msra.mxu0 %v2131_v56  ;;  %v1135_v59 = vmul.f32 %v1103_v57, %v2131_v56  ;;  %v1131_v5 = vmul.f32 %v1099_v61, %v2131_v56  ;;  %v1127_v16 = vmul.f32 %v1095_v8, %v2131_v56  ;;  %v1075_v57 = vld [vmem:[#allocation9 + $0x10] sm:$0xff]  ;;  %v1073_v61 = vld [vmem:[#allocation9] sm:$0xff] }
 0x437   :  { %v1123_v24 = vmul.f32 %v1091_v19, %v2131_v56  ;;  %v1119_v32 = vmul.f32 %v1087_v27, %v2131_v56  ;;  %v1115_v42 = vmul.f32 %v1083_v37, %v2131_v56  ;;  %v1111_v50 = vmul.f32 %v1079_v45, %v2131_v56 }
 0x438   :  { %v1105_v3 = vmul.f32 %v1073_v61, %v2125_v54 }
 0x43a   :  { %637 = vmatpush.xpose.msra.mxu0 %v2125_v54  ;;  %v1757_v54 = vmov 4  }
 0x43b   :  { %v2137_v62 = vpop.f32.mrf.mxu2 }
 0x43c   :  { %616 = vmatmul.f32.gmra.mxu3 %v2137_v62  ;;  %656 = vmatpush.xpose.msra.mxu1 %v2137_v62  ;;  %v1136_v1 = vmul.f32 %v1104_v60, %v2137_v62  ;;  %v1132_v11 = vmul.f32 %v1100_v6, %v2137_v62  ;;  %v1128_v22 = vmul.f32 %v1096_v17, %v2137_v62 }
 0x43d   :  { %638 = vmatmul.f32.vlgmr.msra.gmra.mxu0 %v620_v4  ;;  %v1124_v30 = vmul.f32 %v1092_v25, %v2137_v62  ;;  %v1120_v40 = vmul.f32 %v1088_v34, %v2137_v62  ;;  %v1116_v48 = vmul.f32 %v1084_v43, %v2137_v62  ;;  %v1112_v60 = vmul.f32 %v1080_v52, %v2137_v62  ;;  %v1074_v4 = vld [vmem:[#allocation9 + $0x8] sm:$0xff] }
 0x43e   :  { %1143 = vmatpush.msrb.mxu0 %v1135_v59  ;;  %1166 = vmatpush.msra.mxu2 %v1136_v1  ;;  %v1078_v59 = vld [vmem:[#allocation9 + $0x28] sm:$0xff]  ;;  %v1106_v6 = vmul.f32 %v1074_v4, %v2128_v55 }
 0x43f   :  { %v1110_v1 = vmul.f32 %v1078_v59, %v2128_v55 }
 0x440   :  { %1144 = vmatpush.msrb.mxu0 %v1133_v63  ;;  %657 = vmatpush.xpose.msra.mxu1 %v2128_v55  ;;  %v1107_v63 = vmul.f32 %v1075_v57, %v2131_v56  ;;  %v1756_v56 = vmov 5  }
 0x441   :  { %1167 = vmatpush.msra.mxu2 %v1134_v7 }
 0x442   :  { %1145 = vmatpush.msrb.mxu0 %v1131_v5  ;;  %v1108_v5 = vmul.f32 %v1076_v0, %v2137_v62  ;;  %v1758_v62 = vmov 7  }
 0x443   :  { %1168 = vmatpush.msra.mxu2 %v1132_v11  ;;  %658 = vmatmul.f32.vlgmr.msra.gmra.mxu1 %v621_v15 }
 0x444   :  { %1146 = vmatpush.msrb.mxu0 %v1129_v9 }
 0x445   :  { %1169 = vmatpush.msra.mxu2 %v1130_v18 }
 0x446   :  { %1147 = vmatpush.msrb.mxu0 %v1127_v16 }
 0x447   :  { %1170 = vmatpush.msra.mxu2 %v1128_v22 }
 0x448   :  { %1148 = vmatpush.msrb.mxu0 %v1125_v20 }
 0x449   :  { %1171 = vmatpush.msra.mxu2 %v1126_v26 }
 0x44a   :  { %1149 = vmatpush.msrb.mxu0 %v1123_v24 }
 0x44b   :  { %1172 = vmatpush.msra.mxu2 %v1124_v30 }
 0x44c   :  { %1150 = vmatpush.msrb.mxu0 %v1121_v28 }
 0x44d   :  { %1173 = vmatpush.msra.mxu2 %v1122_v35 }
 0x44e   :  { %1151 = vmatpush.msrb.mxu0 %v1119_v32 }
 0x44f   :  { %1174 = vmatpush.msra.mxu2 %v1120_v40 }
 0x450   :  { %1152 = vmatpush.msrb.mxu0 %v1117_v38 }
 0x451   :  { %1175 = vmatpush.msra.mxu2 %v1118_v44 }
 0x452   :  { %1153 = vmatpush.msrb.mxu0 %v1115_v42 }
 0x453   :  { %1176 = vmatpush.msra.mxu2 %v1116_v48 }
 0x454   :  { %1154 = vmatpush.msrb.mxu0 %v1113_v46 }
 0x455   :  { %1177 = vmatpush.msra.mxu2 %v1114_v53 }
 0x456   :  { %1155 = vmatpush.msrb.mxu0 %v1111_v50 }
 0x457   :  { %1178 = vmatpush.msra.mxu2 %v1112_v60 }
 0x458   :  { %1156 = vmatpush.msrb.mxu0 %v1109_v58 }
 0x459   :  { %1179 = vmatpush.msra.mxu2 %v1110_v1 }
 0x45a   :  { %1157 = vmatpush.msrb.mxu0 %v1107_v63 }
 0x45b   :  { %1180 = vmatpush.msra.mxu2 %v1108_v5 }
 0x45c   :  { %1158 = vmatpush.msrb.mxu0 %v1105_v3 }
 0x45d   :  { %1181 = vmatpush.msra.mxu2 %v1106_v6 }
 0x49a   :  { %v591_v7 = vpop.f32.mrf.mxu1 }
 0x4a6   :  { %v614_v8 = vpop.f32.mrf.mxu3 }
 0x4a7   :  { %v615_v9 = vadd.f32 %v614_v8, %v591_v7 }
 0x4a9   :  { %796 = vperm.xlu0 %1505, %v615_v9   ;;  %755 = vperm.xlu1 %1504, %v615_v9  }
 0x4aa   :  { %714 = vperm.xlu2 %1503, %v615_v9  }
 0x4b1   :  { %1507 = vset.pattern.permute.xlu1 %v1756_v56  ;;  %1511 = vset.pattern.permute.xlu0 %v1750_v13 }
 0x4b2   :  { %1506 = vset.pattern.permute.xlu2 %v1757_v54  ;;  %878 = vperm.xlu1 %1507, %v615_v9  }
 0x4b3   :  { %837 = vperm.xlu2 %1506, %v615_v9   ;;  %v594_v55 = vpop.f32.mrf.mxu1 }
 0x4ba   :  { %1509 = vset.pattern.permute.xlu1 %v1758_v62  ;;  %v639_v13 = vpop.f32.mrf.mxu0 }
 0x4bb   :  { %1508 = vset.pattern.permute.xlu2 %v1759_v10  ;;  %960 = vperm.xlu1 %1509, %v615_v9  }
 0x4bc   :  { %919 = vperm.xlu2 %1508, %v615_v9  }
 0x4bf   :  { %v617_v11 = vpop.f32.mrf.mxu3 }
 0x4c0   :  { %v618_v14 = vadd.f32 %v617_v11, %v594_v55  ;;  %v659_v15 = vpop.f32.mrf.mxu1 }
 0x4c2   :  { %718 = vperm.xlu0 %1511, %v618_v14  }
 0x4c3   :  { %1510 = vset.pattern.permute.xlu1 %v1752_v36 }
 0x4c4   :  { %1512 = vset.pattern.permute.xlu2 %v1751_v33  ;;  %672 = vperm.xlu1 %1510, %v615_v9   ;;  %v2184_v33 = vadd.f32 %v659_v15, %v639_v13 }
 0x4c5   :  { %759 = vperm.xlu2 %1512, %v618_v14  }
 0x4c6   :  { %v721_v16 = vperm.slane %v2184_v33, 1  ;;  %v844_v20 = vperm.slane %v2184_v33, 4  ;;  %v926_v28 = vperm.slane %v2184_v33, 6  ;;  %v803_v29 = vperm.slane %v2184_v33, 3 }
 0x4c7   :  { %v762_v30 = vperm.slane %v2184_v33, 2  ;;  %v885_v44 = vperm.slane %v2184_v33, 5  ;;  %v967_v63 = vperm.slane %v2184_v33, 7 }
 0x4ca   :  { %1516 = vset.pattern.permute.xlu0 %v1759_v10 }
 0x4cb   :  { %923 = vperm.xlu0 %1516, %v618_v14  }
 0x4cc   :  { %1513 = vset.pattern.permute.xlu1 %v1749_v12 }
 0x4cd   :  { %1514 = vset.pattern.permute.xlu2 %v1757_v54  ;;  %800 = vperm.xlu1 %1513, %v618_v14   ;;  %v680_v54 = vperm.slane %v2184_v33, 0 }
 0x4ce   :  { %841 = vperm.xlu2 %1514, %v618_v14  }
 0x4d3   :  { %1539 = vset.pattern.permute.xlu0 %v1758_v62 }
 0x4d5   :  { %1515 = vset.pattern.permute.xlu1 %v1756_v56 }
 0x4d6   :  { %1517 = vset.pattern.permute.xlu2 %v1758_v62  ;;  %882 = vperm.xlu1 %1515, %v618_v14  }
 0x4d7   :  { %964 = vperm.xlu2 %1517, %v618_v14  }
 0x4df   :  { %1518 = vset.pattern.permute.xlu2 %v1752_v36 }
 0x4e0   :  { %677 = vperm.xlu2 %1518, %v618_v14  }
 0x504   :  { %v715_v17 = vpop.permute.xlu2 %714 }
 0x505   :  { %v722_v12 = vadd.f32 %v721_v16, %v715_v17 }
 0x507   :  { %vm724_vm15 = vcmp.gt.f32.partialorder %v722_v12, 0.0  ;;  %v726_v18 = vmul.f32 0.2, %v722_v12 }
 0x509   :  { %v728_v19 = vsel %vm724_vm15, %v722_v12, %v726_v18 }
 0x50a   :  { %v2191_v21 = vadd.f32 %v728_v19, %v1929_v51 }
 0x50c   :  { %v732_v36 = vsel %vm241_vm7, %v2191_v21, -inf }
 0x50d   :  { %v838_v22 = vpop.permute.xlu2 %837  ;;  %733 = vmax.xlane.f32.xlu1 %v732_v36 }
 0x50e   :  { %v845_v23 = vadd.f32 %v844_v20, %v838_v22 }
 0x510   :  { %vm847_vm0 = vcmp.gt.f32.partialorder %v845_v23, 0.0  ;;  %v849_v24 = vmul.f32 0.2, %v845_v23 }
 0x512   :  { %v851_v25 = vsel %vm847_vm0, %v845_v23, %v849_v24 }
 0x513   :  { %v2196_v26 = vadd.f32 %v851_v25, %v1929_v51 }
 0x515   :  { %v855_v27 = vsel %vm241_vm7, %v2196_v26, -inf }
 0x516   :  { %856 = vmax.xlane.f32.xlu1 %v855_v27  ;;  %v920_v31 = vpop.permute.xlu2 %919 }
 0x517   :  { %v927_v35 = vadd.f32 %v926_v28, %v920_v31 }
 0x519   :  { %v931_v41 = vmul.f32 0.2, %v927_v35  ;;  %vm929_vm4 = vcmp.gt.f32.partialorder %v927_v35, 0.0 }
 0x51b   :  { %v797_v32 = vpop.permute.xlu0 %796  ;;  %v756_v34 = vpop.permute.xlu1 %755  ;;  %v933_v50 = vsel %vm929_vm4, %v927_v35, %v931_v41  ;;  %vm1064_vm4 = vcmask 654336  }
 0x51c   :  { %v804_v37 = vadd.f32 %v803_v29, %v797_v32  ;;  %v763_v38 = vadd.f32 %v762_v30, %v756_v34  ;;  %v2221_v58 = vadd.f32 %v933_v50, %v1929_v51 }
 0x51e   :  { %vm806_vm2 = vcmp.gt.f32.partialorder %v804_v37, 0.0  ;;  %v808_v39 = vmul.f32 0.2, %v804_v37  ;;  %vm765_vm3 = vcmp.gt.f32.partialorder %v763_v38, 0.0  ;;  %v767_v40 = vmul.f32 0.2, %v763_v38 }
 0x51f   :  { %v760_v53 = vpop.permute.xlu2 %759  ;;  %v937_v61 = vsel %vm241_vm7, %v2221_v58, -inf }
 0x520   :  { %v810_v42 = vsel %vm806_vm2, %v804_v37, %v808_v39  ;;  %v769_v43 = vsel %vm765_vm3, %v763_v38, %v767_v40  ;;  %v764_v55 = vadd.f32 %v762_v30, %v760_v53 }
 0x521   :  { %v2209_v45 = vadd.f32 %v810_v42, %v1929_v51  ;;  %v2212_v46 = vadd.f32 %v769_v43, %v1929_v51 }
 0x522   :  { %vm766_vm11 = vcmp.gt.f32.partialorder %v764_v55, 0.0 }
 0x523   :  { %v814_v47 = vsel %vm241_vm7, %v2209_v45, -inf  ;;  %v773_v48 = vsel %vm241_vm7, %v2212_v46, -inf }
 0x524   :  { %v879_v49 = vpop.permute.xlu1 %878  ;;  %815 = vmax.xlane.f32.xlu2 %v814_v47  ;;  %774 = vmax.xlane.f32.xlu0 %v773_v48 }
 0x525   :  { %v886_v52 = vadd.f32 %v885_v44, %v879_v49 }
 0x527   :  { %vm888_vm5 = vcmp.gt.f32.partialorder %v886_v52, 0.0  ;;  %v890_v57 = vmul.f32 0.2, %v886_v52 }
 0x528   :  { %v842_v4 = vpop.permute.xlu2 %841 }
 0x529   :  { %v892_v59 = vsel %vm888_vm5, %v886_v52, %v890_v57  ;;  %v846_v9 = vadd.f32 %v844_v20, %v842_v4  ;;  %vm1067_vm5 = vcmask 785408  }
 0x52a   :  { %v2224_v60 = vadd.f32 %v892_v59, %v1929_v51 }
 0x52b   :  { %v850_v13 = vmul.f32 0.2, %v846_v9  ;;  %vm848_vm10 = vcmp.gt.f32.partialorder %v846_v9, 0.0 }
 0x52c   :  { %938 = vmax.xlane.f32.xlu2 %v937_v61  ;;  %v896_v0 = vsel %vm241_vm7, %v2224_v60, -inf }
 0x52d   :  { %v961_v1 = vpop.permute.xlu1 %960  ;;  %897 = vmax.xlane.f32.xlu0 %v896_v0  ;;  %v852_v24 = vsel %vm848_vm10, %v846_v9, %v850_v13 }
 0x52e   :  { %v968_v3 = vadd.f32 %v967_v63, %v961_v1  ;;  %v2254_v34 = vadd.f32 %v852_v24, %v1936_v2 }
 0x530   :  { %vm970_vm6 = vcmp.gt.f32.partialorder %v968_v3, 0.0  ;;  %v972_v5 = vmul.f32 0.2, %v968_v3  ;;  %v858_v39 = vsel %vm241_vm7, %v2254_v34, -inf }
 0x531   :  { %v965_v12 = vpop.permute.xlu2 %964 }
 0x532   :  { %v974_v6 = vsel %vm970_vm6, %v968_v3, %v972_v5  ;;  %v969_v22 = vadd.f32 %v967_v63, %v965_v12  ;;  %vm1070_vm6 = vcmask 916480  }
 0x533   :  { %v2232_v7 = vadd.f32 %v974_v6, %v1929_v51 }
 0x534   :  { %v719_v8 = vpop.permute.xlu0 %718  ;;  %vm971_vm12 = vcmp.gt.f32.partialorder %v969_v22, 0.0 }
 0x535   :  { %v723_v56 = vadd.f32 %v721_v16, %v719_v8  ;;  %v978_v62 = vsel %vm241_vm7, %v2232_v7, -inf  ;;  %v768_v16 = vmul.f32 0.2, %v764_v55 }
 0x536   :  { %v673_v10 = vpop.permute.xlu1 %672  ;;  %979 = vmax.xlane.f32.xlu1 %v978_v62 }
 0x537   :  { %vm725_vm8 = vcmp.gt.f32.partialorder %v723_v56, 0.0  ;;  %v727_v11 = vmul.f32 0.2, %v723_v56  ;;  %v681_v14 = vadd.f32 %v680_v54, %v673_v10  ;;  %v770_v30 = vsel %vm766_vm11, %v764_v55, %v768_v16 }
 0x538   :  { %v2257_v37 = vadd.f32 %v770_v30, %v1936_v2 }
 0x539   :  { %vm683_vm9 = vcmp.gt.f32.partialorder %v681_v14, 0.0  ;;  %v685_v15 = vmul.f32 0.2, %v681_v14  ;;  %v729_v17 = vsel %vm725_vm8, %v723_v56, %v727_v11 }
 0x53a   :  { %v2240_v18 = vadd.f32 %v729_v17, %v1936_v2  ;;  %v678_v41 = vpop.permute.xlu2 %677  ;;  %v776_v42 = vsel %vm241_vm7, %v2257_v37, -inf }
 0x53b   :  { %v687_v19 = vsel %vm683_vm9, %v681_v14, %v685_v15  ;;  %v682_v47 = vadd.f32 %v680_v54, %v678_v41 }
 0x53c   :  { %v735_v20 = vsel %vm241_vm7, %v2240_v18, -inf  ;;  %v2245_v36 = vadd.f32 %v687_v19, %v1929_v51  ;;  %v973_v51 = vmul.f32 0.2, %v969_v22 }
 0x53d   :  { %736 = vmax.xlane.f32.xlu0 %v735_v20  ;;  %v924_v23 = vpop.permute.xlu0 %923  ;;  %v686_v59 = vmul.f32 0.2, %v682_v47  ;;  %vm684_vm3 = vcmp.gt.f32.partialorder %v682_v47, 0.0 }
 0x53e   :  { %v691_v25 = vsel %vm241_vm7, %v2245_v36, -inf  ;;  %v928_v31 = vadd.f32 %v926_v28, %v924_v23 }
 0x53f   :  { %v801_v27 = vpop.permute.xlu1 %800  ;;  %692 = vmax.xlane.f32.xlu2 %v691_v25 }
 0x540   :  { %v805_v32 = vadd.f32 %v803_v29, %v801_v27  ;;  %v932_v38 = vmul.f32 0.2, %v928_v31  ;;  %vm930_vm0 = vcmp.gt.f32.partialorder %v928_v31, 0.0  ;;  %v975_v29 = vsel %vm971_vm12, %v969_v22, %v973_v51 }
 0x541   :  { %v2269_v49 = vadd.f32 %v975_v29, %v1936_v2 }
 0x542   :  { %vm807_vm15 = vcmp.gt.f32.partialorder %v805_v32, 0.0  ;;  %v809_v35 = vmul.f32 0.2, %v805_v32  ;;  %v934_v50 = vsel %vm930_vm0, %v928_v31, %v932_v38 }
 0x543   :  { %v2274_v57 = vadd.f32 %v934_v50, %v1936_v2  ;;  %v981_v61 = vsel %vm241_vm7, %v2269_v49, -inf }
 0x544   :  { %v811_v40 = vsel %vm807_vm15, %v805_v32, %v809_v35 }
 0x545   :  { %859 = vmax.xlane.f32.xlu0 %v858_v39  ;;  %v2262_v28 = vadd.f32 %v811_v40, %v1936_v2  ;;  %v940_v1 = vsel %vm241_vm7, %v2274_v57, -inf }
 0x547   :  { %777 = vmax.xlane.f32.xlu2 %v776_v42  ;;  %v817_v43 = vsel %vm241_vm7, %v2262_v28, -inf }
 0x548   :  { %818 = vmax.xlane.f32.xlu1 %v817_v43  ;;  %v883_v48 = vpop.permute.xlu1 %882 }
 0x549   :  { %v887_v52 = vadd.f32 %v885_v44, %v883_v48  ;;  %v688_v44 = vsel %vm684_vm3, %v682_v47, %v686_v59 }
 0x54a   :  { %v2286_v3 = vadd.f32 %v688_v44, %v1936_v2 }
 0x54b   :  { %vm889_vm2 = vcmp.gt.f32.partialorder %v887_v52, 0.0  ;;  %v891_v53 = vmul.f32 0.2, %v887_v52 }
 0x54c   :  { %v694_v4 = vsel %vm241_vm7, %v2286_v3, -inf }
 0x54d   :  { %982 = vmax.xlane.f32.xlu0 %v981_v61  ;;  %v893_v63 = vsel %vm889_vm2, %v887_v52, %v891_v53 }
 0x54e   :  { %v2279_v0 = vadd.f32 %v893_v63, %v1936_v2 }
 0x550   :  { %941 = vmax.xlane.f32.xlu1 %v940_v1  ;;  %v899_v33 = vsel %vm241_vm7, %v2279_v0, -inf }
 0x551   :  { %900 = vmax.xlane.f32.xlu2 %v899_v33 }
 0x558   :  { %695 = vmax.xlane.f32.xlu1 %v694_v4 }
 0x580   :  { %v734_v5 = vpop.xlane.xlu1 %733 }
 0x581   :  { %v738_v6 = vsub.f32 %v2191_v21, %v734_v5 }
 0x583   :  { %v740_v8 = vmul.f32 1.442695, %v738_v6 }
 0x585   :  { %1575 = vpow2.f32 %v740_v8 }
 0x589   :  { %v857_v9 = vpop.xlane.xlu1 %856 }
 0x58a   :  { %v861_v56 = vsub.f32 %v2196_v26, %v857_v9 }
 0x58b   :  { %v2292_v54 = vpop.eup %1575 }
 0x58c   :  { %v863_v62 = vmul.f32 1.442695, %v861_v56  ;;  %v744_v10 = vsel %vm241_vm7, %v2292_v54, 0.0 }
 0x58d   :  { %745 = vadd.xlane.f32.xlu0 %v744_v10 }
 0x58e   :  { %1577 = vpow2.f32 %v863_v62 }
 0x594   :  { %v2296_v2 = vpop.eup %1577 }
 0x595   :  { %v867_v55 = vsel %vm241_vm7, %v2296_v2, 0.0 }
 0x596   :  { %868 = vadd.xlane.f32.xlu0 %v867_v55 }
 0x597   :  { %v816_v21 = vpop.xlane.xlu2 %815  ;;  %v775_v11 = vpop.xlane.xlu0 %774 }
 0x598   :  { %v820_v14 = vsub.f32 %v2209_v45, %v816_v21  ;;  %v779_v26 = vsub.f32 %v2212_v46, %v775_v11 }
 0x59a   :  { %v822_v13 = vmul.f32 1.442695, %v820_v14  ;;  %v781_v15 = vmul.f32 1.442695, %v779_v26 }
 0x59c   :  { %1579 = vpow2.f32 %v822_v13 }
 0x59d   :  { %1581 = vpow2.f32 %v781_v15 }
 0x59f   :  { %v939_v17 = vpop.xlane.xlu2 %938 }
 0x5a0   :  { %v943_v12 = vsub.f32 %v2221_v58, %v939_v17  ;;  %v898_v16 = vpop.xlane.xlu0 %897 }
 0x5a1   :  { %v902_v19 = vsub.f32 %v2224_v60, %v898_v16 }
 0x5a2   :  { %v2304_v20 = vpop.eup %1579  ;;  %v945_v22 = vmul.f32 1.442695, %v943_v12 }
 0x5a3   :  { %v2306_v23 = vpop.eup %1581  ;;  %v904_v24 = vmul.f32 1.442695, %v902_v19  ;;  %v826_v45 = vsel %vm241_vm7, %v2304_v20, 0.0 }
 0x5a4   :  { %1583 = vpow2.f32 %v945_v22  ;;  %827 = vadd.xlane.f32.xlu1 %v826_v45  ;;  %v785_v46 = vsel %vm241_vm7, %v2306_v23, 0.0 }
 0x5a5   :  { %1585 = vpow2.f32 %v904_v24  ;;  %786 = vadd.xlane.f32.xlu2 %v785_v46 }
 0x5a9   :  { %v980_v58 = vpop.xlane.xlu1 %979 }
 0x5aa   :  { %v2312_v25 = vpop.eup %1583  ;;  %v984_v60 = vsub.f32 %v2232_v7, %v980_v58 }
 0x5ab   :  { %v2315_v27 = vpop.eup %1585  ;;  %v949_v30 = vsel %vm241_vm7, %v2312_v25, 0.0 }
 0x5ac   :  { %v986_v31 = vmul.f32 1.442695, %v984_v60  ;;  %950 = vadd.xlane.f32.xlu1 %v949_v30  ;;  %v908_v32 = vsel %vm241_vm7, %v2315_v27, 0.0 }
 0x5ad   :  { %909 = vadd.xlane.f32.xlu2 %v908_v32 }
 0x5ae   :  { %1587 = vpow2.f32 %v986_v31 }
 0x5b0   :  { %v737_v51 = vpop.xlane.xlu0 %736 }
 0x5b1   :  { %v739_v35 = vsub.f32 %v2240_v18, %v737_v51 }
 0x5b2   :  { %v693_v38 = vpop.xlane.xlu2 %692 }
 0x5b3   :  { %v742_v39 = vmul.f32 1.442695, %v739_v35  ;;  %v697_v40 = vsub.f32 %v2245_v36, %v693_v38 }
 0x5b4   :  { %v2323_v7 = vpop.eup %1587 }
 0x5b5   :  { %1589 = vpow2.f32 %v742_v39  ;;  %v699_v41 = vmul.f32 1.442695, %v697_v40  ;;  %v990_v29 = vsel %vm241_vm7, %v2323_v7, 0.0 }
 0x5b6   :  { %991 = vadd.xlane.f32.xlu0 %v990_v29 }
 0x5b7   :  { %1591 = vpow2.f32 %v699_v41 }
 0x5b8   :  { %v860_v42 = vpop.xlane.xlu0 %859 }
 0x5b9   :  { %v862_v43 = vsub.f32 %v2254_v34, %v860_v42 }
 0x5ba   :  { %v778_v47 = vpop.xlane.xlu2 %777 }
 0x5bb   :  { %v2328_v48 = vpop.eup %1589  ;;  %v865_v18 = vmul.f32 1.442695, %v862_v43  ;;  %v780_v50 = vsub.f32 %v2257_v37, %v778_v47  ;;  %v819_v52 = vpop.xlane.xlu1 %818 }
 0x5bc   :  { %v821_v36 = vsub.f32 %v2262_v28, %v819_v52  ;;  %v747_v53 = vsel %vm241_vm7, %v2328_v48, 0.0 }
 0x5bd   :  { %v2334_v59 = vpop.eup %1591  ;;  %1593 = vpow2.f32 %v865_v18  ;;  %v783_v61 = vmul.f32 1.442695, %v780_v50  ;;  %748 = vadd.xlane.f32.xlu2 %v747_v53 }
 0x5be   :  { %v824_v63 = vmul.f32 1.442695, %v821_v36  ;;  %v703_v34 = vsel %vm241_vm7, %v2334_v59, 0.0 }
 0x5bf   :  { %1595 = vpow2.f32 %v783_v61  ;;  %704 = vadd.xlane.f32.xlu1 %v703_v34 }
 0x5c0   :  { %1597 = vpow2.f32 %v824_v63  ;;  %v983_v1 = vpop.xlane.xlu0 %982 }
 0x5c1   :  { %v985_v37 = vsub.f32 %v2269_v49, %v983_v1 }
 0x5c3   :  { %v2339_v33 = vpop.eup %1593  ;;  %v988_v28 = vmul.f32 1.442695, %v985_v37  ;;  %v942_v44 = vpop.xlane.xlu1 %941 }
 0x5c4   :  { %v944_v4 = vsub.f32 %v2274_v57, %v942_v44  ;;  %v901_v5 = vpop.xlane.xlu2 %900  ;;  %v870_v6 = vsel %vm241_vm7, %v2339_v33, 0.0 }
 0x5c5   :  { %v2344_v8 = vpop.eup %1595  ;;  %1599 = vpow2.f32 %v988_v28  ;;  %v903_v9 = vsub.f32 %v2279_v0, %v901_v5  ;;  %871 = vadd.xlane.f32.xlu2 %v870_v6 }
 0x5c6   :  { %v2347_v56 = vpop.eup %1597  ;;  %v947_v62 = vmul.f32 1.442695, %v944_v4  ;;  %v788_v49 = vsel %vm241_vm7, %v2344_v8, 0.0 }
 0x5c7   :  { %v906_v10 = vmul.f32 1.442695, %v903_v9  ;;  %789 = vadd.xlane.f32.xlu1 %v788_v49  ;;  %v829_v57 = vsel %vm241_vm7, %v2347_v56, 0.0 }
 0x5c8   :  { %1601 = vpow2.f32 %v947_v62  ;;  %830 = vadd.xlane.f32.xlu0 %v829_v57 }
 0x5c9   :  { %1603 = vpow2.f32 %v906_v10 }
 0x5cb   :  { %v2353_v55 = vpop.eup %1599  ;;  %v696_v21 = vpop.xlane.xlu1 %695 }
 0x5cc   :  { %v698_v0 = vsub.f32 %v2286_v3, %v696_v21  ;;  %v993_v11 = vsel %vm241_vm7, %v2353_v55, 0.0 }
 0x5cd   :  { %994 = vadd.xlane.f32.xlu2 %v993_v11 }
 0x5ce   :  { %v2358_v14 = vpop.eup %1601  ;;  %v701_v26 = vmul.f32 1.442695, %v698_v0 }
 0x5cf   :  { %v2360_v13 = vpop.eup %1603  ;;  %v952_v15 = vsel %vm241_vm7, %v2358_v14, 0.0 }
 0x5d0   :  { %1605 = vpow2.f32 %v701_v26  ;;  %953 = vadd.xlane.f32.xlu0 %v952_v15  ;;  %v911_v17 = vsel %vm241_vm7, %v2360_v13, 0.0 }
 0x5d1   :  { %912 = vadd.xlane.f32.xlu1 %v911_v17 }
 0x5d6   :  { %v2366_v12 = vpop.eup %1605 }
 0x5d7   :  { %v706_v3 = vsel %vm241_vm7, %v2366_v12, 0.0 }
 0x5d8   :  { %707 = vadd.xlane.f32.xlu0 %v706_v3 }
 0x600   :  { %v746_v22 = vpop.xlane.xlu0 %745 }
 0x601   :  { %1607 = vrcp.f32 %v746_v22 }
 0x607   :  { %v1608_v31 = vpop.eup %1607 }
 0x608   :  { %v752_v35 = vmul.f32 %v1608_v31, %v2292_v54 }
 0x609   :  { %v869_v46 = vpop.xlane.xlu0 %868 }
 0x617   :  { %v828_v19 = vpop.xlane.xlu1 %827 }
 0x618   :  { %v787_v16 = vpop.xlane.xlu2 %786 }
 0x61f   :  { %v951_v45 = vpop.xlane.xlu1 %950 }
 0x620   :  { %v910_v24 = vpop.xlane.xlu2 %909 }
 0x629   :  { %v992_v30 = vpop.xlane.xlu0 %991 }
 0x630   :  { %v749_v58 = vpop.xlane.xlu2 %748 }
 0x631   :  { %1609 = vrcp.f32 %v749_v58 }
 0x632   :  { %v2370_v60 = vpop.xlane.xlu1 %704  ;;  %1611 = vrcp.f32 %v869_v46 }
 0x633   :  { %1613 = vrcp.f32 %v787_v16 }
 0x637   :  { %v1610_v32 = vpop.eup %1609 }
 0x638   :  { %v872_v51 = vpop.xlane.xlu2 %871  ;;  %v753_v38 = vmul.f32 %v1610_v32, %v2328_v48  ;;  %v1612_v29 = vpop.eup %1611 }
 0x639   :  { %1615 = vrcp.f32 %v872_v51  ;;  %v1614_v42 = vpop.eup %1613  ;;  %v875_v18 = vmul.f32 %v1612_v29, %v2296_v2 }
 0x63a   :  { %1617 = vrcp.f32 %v828_v19  ;;  %v790_v39 = vpop.xlane.xlu1 %789  ;;  %v1519_v40 = vpack.i.bf16 %v753_v38, %v752_v35  ;;  %v793_v36 = vmul.f32 %v1614_v42, %v2306_v23 }
 0x63b   :  { %1619 = vrcp.f32 %v790_v39  ;;  %v831_v41 = vpop.xlane.xlu0 %830 }
 0x63c   :  { %1520 = vrot.lane.b32.xlu2 %v1519_v40, %s1748_s30  ;;  %1621 = vrcp.f32 %v831_v41  ;;  %s1761_s30 = smov 112  }
 0x63d   :  { %1623 = vrcp.f32 %v992_v30 }
 0x63e   :  { %1625 = vrcp.f32 %v951_v45 }
 0x63f   :  { %v1616_v43 = vpop.eup %1615  ;;  %1627 = vrcp.f32 %v910_v24 }
 0x640   :  { %v1618_v47 = vpop.eup %1617  ;;  %v876_v50 = vmul.f32 %v1616_v43, %v2339_v33  ;;  %v995_v1 = vpop.xlane.xlu2 %994 }
 0x641   :  { %v1620_v54 = vpop.eup %1619  ;;  %v834_v61 = vmul.f32 %v1618_v47, %v2304_v20  ;;  %1629 = vrcp.f32 %v995_v1  ;;  %v1137_v47 = vld [vmem:[%s2609_s11] sm:$0x3] }
 0x642   :  { %v1622_v48 = vpop.eup %1621  ;;  %v1534_v52 = vpack.i.bf16 %v876_v50, %v875_v18  ;;  %v794_v53 = vmul.f32 %v1620_v54, %v2344_v8  ;;  %v1139_v18 = vperm.slane %v1137_v47, 0 }
 0x643   :  { %v835_v63 = vmul.f32 %v1622_v48, %v2347_v56  ;;  %v1624_v37 = vpop.eup %1623  ;;  %v954_v23 = vpop.xlane.xlu0 %953 }
 0x644   :  { %1535 = vrot.lane.b32.xlu2 %v1534_v52, %s1760_s10  ;;  %v1524_v2 = vpack.i.bf16 %v794_v53, %v793_v36  ;;  %v1626_v33 = vpop.eup %1625  ;;  %v913_v28 = vpop.xlane.xlu1 %912  ;;  %v998_v20 = vmul.f32 %v1624_v37, %v2323_v7  ;;  %1631 = vrcp.f32 %v954_v23 }
 0x645   :  { %v1529_v34 = vpack.i.bf16 %v835_v63, %v834_v61  ;;  %v1628_v44 = vpop.eup %1627  ;;  %1633 = vrcp.f32 %v913_v28  ;;  %v957_v4 = vmul.f32 %v1626_v33, %v2312_v25  ;;  %v1140_v61 = vperm.slane %v1137_v47, 1  ;;  %v1321_v28 = vld [vmem:[%s2611_s13 + $0xf8] sm:$0xff]  ;;  %v1323_v47 = vld [vmem:[%s2611_s13 + $0x108] sm:$0xff] }
 0x646   :  { %1525 = vrot.lane.b32.xlu1 %v1524_v2, %s1755_s20  ;;  %v916_v5 = vmul.f32 %v1628_v44, %v2315_v27  ;;  %s1763_s20 = smov 80   ;;  %1635 = vrcp.f32 %v2370_v60  ;;  %1357 = vmatpush.msra.mxu0 %v1321_v28  ;;  %v1320_v44 = vld [vmem:[%s2611_s13 + $0xf0] sm:$0xff]  ;;  %v1402_v28 = vld [vmem:[%s2613_s15 + $0x20] sm:$0xff] }
 0x647   :  { %1530 = vrot.lane.b32.xlu0 %v1529_v34, %s1754_s16  ;;  %v1630_v6 = vpop.eup %1629 }
 0x648   :  { %v999_v56 = vmul.f32 %v1630_v6, %v2353_v55  ;;  %1358 = vmatpush.msra.mxu0 %v1320_v44  ;;  %v1316_v6 = vld [vmem:[%s2611_s13 + $0xd0] sm:$0xff]  ;;  %v1401_v44 = vld [vmem:[%s2613_s15 + $0x18] sm:$0xff] }
 0x64a   :  { %v1632_v8 = vpop.eup %1631 }
 0x64b   :  { %v1634_v9 = vpop.eup %1633  ;;  %v958_v7 = vmul.f32 %v1632_v8, %v2358_v14  ;;  %v708_v25 = vpop.xlane.xlu0 %707 }
 0x64c   :  { %1050 = vrot.lane.b32.xlu2 %v998_v20, %s1761_s30  ;;  %v917_v62 = vmul.f32 %v1634_v9, %v2360_v13  ;;  %v1636_v27 = vpop.eup %1635  ;;  %1637 = vrcp.f32 %v708_v25  ;;  %v1319_v20 = vld [vmem:[%s2611_s13 + $0xe8] sm:$0xff] }
 0x64d   :  { %v711_v21 = vmul.f32 %v1636_v27, %v2334_v59  ;;  %1359 = vmatpush.msra.mxu0 %v1319_v20  ;;  %v1315_v9 = vld [vmem:[%s2611_s13 + $0xc8] sm:$0xff]  ;;  %v1400_v20 = vld [vmem:[%s2613_s15 + $0x10] sm:$0xff] }
 0x64e   :  { %1042 = vrot.lane.b32.xlu1 %v957_v4, %s1762_s8  ;;  %v1318_v4 = vld [vmem:[%s2611_s13 + $0xe0] sm:$0xff] }
 0x64f   :  { %1034 = vrot.lane.b32.xlu0 %v916_v5, %s1763_s20  ;;  %1360 = vmatpush.msra.mxu0 %v1318_v4  ;;  %v1317_v5 = vld [vmem:[%s2611_s13 + $0xd8] sm:$0xff]  ;;  %v1399_v4 = vld [vmem:[%s2613_s15 + $0x8] sm:$0xff] }
 0x651   :  { %1361 = vmatpush.msra.mxu0 %v1317_v5  ;;  %v1398_v5 = vld [vmem:[%s2613_s15] sm:$0xff] }
 0x652   :  { %v1638_v15 = vpop.eup %1637 }
 0x653   :  { %v712_v22 = vmul.f32 %v1638_v15, %v2366_v12  ;;  %1362 = vmatpush.msra.mxu0 %v1316_v6  ;;  %v1302_v15 = vld [vmem:[%s2611_s13 + $0x60] sm:$0xff] }
 0x654   :  { %1052 = vrot.lane.b32.xlu2 %v999_v56, %s1761_s30  ;;  %v1314_v56 = vld [vmem:[%s2611_s13 + $0xc0] sm:$0xff] }
 0x655   :  { %1363 = vmatpush.msra.mxu0 %v1315_v9  ;;  %v1541_v6 = vld [vmem:[%s2612_s14] ss:$0 sm:$0xff] }
 0x656   :  { %1044 = vrot.lane.b32.xlu1 %v958_v7, %s1762_s8  ;;  %v1313_v7 = vld [vmem:[%s2611_s13 + $0xb8] sm:$0xff] }
 0x657   :  { %1036 = vrot.lane.b32.xlu0 %v917_v62, %s1763_s20  ;;  %1364 = vmatpush.msra.mxu0 %v1314_v56 }
 0x659   :  { %1365 = vmatpush.msra.mxu0 %v1313_v7 }
 0x696   :  { %v1521_v49 = vpop.permute.xlu2 %1520 }
 0x697   :  { %v1522_v10 = vunpack.i.l.bf16 %v1521_v49  ;;  %v1523_v17 = vunpack.i.h.bf16 %v1521_v49  ;;  %v1312_v49 = vld [vmem:[%s2611_s13 + $0xb0] sm:$0xff] }
 0x698   :  { %1366 = vmatpush.msra.mxu0 %v1312_v49 }
 0x699   :  { %v1056_v26 = vsel %vm241_vm7, %v711_v21, %v1522_v10  ;;  %v1057_v58 = vsel %vm241_vm7, %v712_v22, %v1523_v17  ;;  %v1329_v17 = vld [vmem:[%s2611_s13 + $0x138] sm:$0xff]  ;;  %v1300_v22 = vld [vmem:[%s2611_s13 + $0x50] sm:$0xff] }
 0x69e   :  { %v1536_v57 = vpop.permute.xlu2 %1535 }
 0x69f   :  { %v1537_v16 = vunpack.i.l.bf16 %v1536_v57  ;;  %v1538_v35 = vunpack.i.h.bf16 %v1536_v57  ;;  %v1311_v57 = vld [vmem:[%s2611_s13 + $0xa8] sm:$0xff] }
 0x6a0   :  { %1367 = vmatpush.msra.mxu0 %v1311_v57 }
 0x6a6   :  { %v1051_v59 = vpop.permute.xlu2 %1050 }
 0x6ae   :  { %v1053_v29 = vpop.permute.xlu2 %1052 }
 0x6b8   :  { %v1526_v0 = vpop.permute.xlu1 %1525 }
 0x6b9   :  { %v1527_v11 = vunpack.i.l.bf16 %v1526_v0  ;;  %v1531_v55 = vpop.permute.xlu0 %1530  ;;  %v1528_v19 = vunpack.i.h.bf16 %v1526_v0  ;;  %v1220_v0 = vld [vmem:[#allocation4] sm:$0x3] }
 0x6ba   :  { %v1532_v14 = vunpack.i.l.bf16 %v1531_v55  ;;  %v1533_v60 = vunpack.i.h.bf16 %v1531_v55 }
 0x6bb   :  { %v1058_v13 = vsel %vm413_vm13, %v1056_v26, %v1527_v11  ;;  %v1059_v31 = vsel %vm413_vm13, %v1057_v58, %v1528_v19  ;;  %vm1213_vm13 = vcmask 1048064   ;;  %v1305_v11 = vld [vmem:[%s2611_s13 + $0x78] sm:$0xff]  ;;  %v1304_v26 = vld [vmem:[%s2611_s13 + $0x70] sm:$0xff]  ;;  %v1295_v58 = vld [vmem:[%s2611_s13 + $0x28] sm:$0xff] }
 0x6bc   :  { %v1060_v3 = vsel %vm416_vm14, %v1058_v13, %v1532_v14  ;;  %v1061_v12 = vsel %vm416_vm14, %v1059_v31, %v1533_v60  ;;  %v1303_v14 = vld [vmem:[%s2611_s13 + $0x68] sm:$0xff]  ;;  %v1328_v19 = vld [vmem:[%s2611_s13 + $0x130] sm:$0xff]  ;;  %v1294_v60 = vld [vmem:[%s2611_s13 + $0x20] sm:$0xff] }
 0x6bd   :  { %v1062_v46 = vsel %vm158_vm1, %v1060_v3, %v1537_v16  ;;  %v1063_v39 = vsel %vm158_vm1, %v1061_v12, %v1538_v35  ;;  %v1301_v16 = vld [vmem:[%s2611_s13 + $0x58] sm:$0xff]  ;;  %v1292_v31 = vld [vmem:[%s2611_s13 + $0x10] sm:$0xff]  ;;  %v1310_v12 = vld [vmem:[%s2611_s13 + $0xa0] sm:$0xff] }
 0x6be   :  { %v1327_v35 = vld [vmem:[%s2611_s13 + $0x128] sm:$0xff]  ;;  %1368 = vmatpush.msra.mxu0 %v1310_v12 }
 0x6c0   :  { %v1043_v24 = vpop.permute.xlu1 %1042 }
 0x6c1   :  { %v1035_v45 = vpop.permute.xlu0 %1034 }
 0x6c2   :  { %v1065_v30 = vsel %vm1064_vm4, %v1062_v46, %v1035_v45  ;;  %v1297_v45 = vld [vmem:[%s2611_s13 + $0x38] sm:$0xff]  ;;  %v1296_v46 = vld [vmem:[%s2611_s13 + $0x30] sm:$0xff] }
 0x6c3   :  { %v1068_v32 = vsel %vm1067_vm5, %v1065_v30, %v1043_v24  ;;  %v1299_v24 = vld [vmem:[%s2611_s13 + $0x48] sm:$0xff]  ;;  %v1293_v30 = vld [vmem:[%s2611_s13 + $0x18] sm:$0xff] }
 0x6c4   :  { %v1071_v51 = vsel %vm1070_vm6, %v1068_v32, %v1051_v59  ;;  %v1298_v59 = vld [vmem:[%s2611_s13 + $0x40] sm:$0xff]  ;;  %v1291_v32 = vld [vmem:[%s2611_s13 + $0x8] sm:$0xff] }
 0x6c5   :  { %1159 = vmatmul.f32.vlgmr.msrb.gmra.mxu0 %v1071_v51  ;;  %1182 = vmatmul.f32.vlgmr.msra.gmra.mxu2 %v1071_v51  ;;  %v1290_v51 = vld [vmem:[%s2611_s13] sm:$0xff] }
 0x6c8   :  { %v1045_v40 = vpop.permute.xlu1 %1044 }
 0x6c9   :  { %v1037_v38 = vpop.permute.xlu0 %1036 }
 0x6ca   :  { %v1066_v41 = vsel %vm1064_vm4, %v1063_v39, %v1037_v38  ;;  %v1309_v38 = vld [vmem:[%s2611_s13 + $0x98] sm:$0xff]  ;;  %v1326_v39 = vld [vmem:[%s2611_s13 + $0x120] sm:$0xff] }
 0x6cb   :  { %v1069_v42 = vsel %vm1067_vm5, %v1066_v41, %v1045_v40  ;;  %v1308_v40 = vld [vmem:[%s2611_s13 + $0x90] sm:$0xff]  ;;  %1369 = vmatpush.msra.mxu0 %v1309_v38  ;;  %v1325_v41 = vld [vmem:[%s2611_s13 + $0x118] sm:$0xff] }
 0x6cc   :  { %v1072_v43 = vsel %vm1070_vm6, %v1069_v42, %v1053_v29  ;;  %v1307_v29 = vld [vmem:[%s2611_s13 + $0x88] sm:$0xff]  ;;  %v1324_v42 = vld [vmem:[%s2611_s13 + $0x110] sm:$0xff] }
 0x6cd   :  { %1162 = vmatmul.f32.gmra.mxu0 %v1072_v43  ;;  %1185 = vmatmul.f32.gmra.mxu2 %v1072_v43  ;;  %v1306_v43 = vld [vmem:[%s2611_s13 + $0x80] sm:$0xff] }
 0x6ce   :  { %1370 = vmatpush.msra.mxu0 %v1308_v40 }
 0x6d0   :  { %1371 = vmatpush.msra.mxu0 %v1307_v29 }
 0x6d2   :  { %1372 = vmatpush.msra.mxu0 %v1306_v43 }
 0x742   :  { %v1160_v50 = vpop.f32.mrf.mxu0 }
 0x743   :  { %v1161_v54 = vadd.f32 %v1160_v50, %v1139_v18  ;;  %v1413_v50 = vld [vmem:[%s2613_s15 + $0x78] sm:$0xff] }
 0x744   :  { %1418 = vmatpush.msrb.mxu2 %v1413_v50 }
 0x745   :  { %v1189_v48 = vmax.f32 %v1161_v54, 0.0  ;;  %v1412_v54 = vld [vmem:[%s2613_s15 + $0x70] sm:$0xff] }
 0x746   :  { %1419 = vmatpush.msrb.mxu2 %v1412_v54 }
 0x747   :  { %1197 = vrot.lane.b32.xlu2 %v1189_v48, %s1760_s10  ;;  %v1411_v48 = vld [vmem:[%s2613_s15 + $0x68] sm:$0xff] }
 0x748   :  { %v1183_v52 = vpop.f32.mrf.mxu2  ;;  %1420 = vmatpush.msrb.mxu2 %v1411_v48 }
 0x749   :  { %v1184_v34 = vadd.f32 %v1183_v52, %v1140_v61  ;;  %v1410_v52 = vld [vmem:[%s2613_s15 + $0x60] sm:$0xff] }
 0x74a   :  { %v1163_v36 = vpop.f32.mrf.mxu0  ;;  %1421 = vmatpush.msrb.mxu2 %v1410_v52 }
 0x74b   :  { %v1164_v53 = vadd.f32 %v1163_v36, %v1139_v18  ;;  %v1190_v23 = vmax.f32 %v1184_v34, 0.0  ;;  %v1322_v18 = vld [vmem:[%s2611_s13 + $0x100] sm:$0xff]  ;;  %v1409_v36 = vld [vmem:[%s2613_s15 + $0x58] sm:$0xff]  ;;  %v1404_v34 = vld [vmem:[%s2613_s15 + $0x30] sm:$0xff] }
 0x74c   :  { %1422 = vmatpush.msrb.mxu2 %v1409_v36 }
 0x74d   :  { %v1191_v63 = vmax.f32 %v1164_v53, 0.0  ;;  %v1408_v53 = vld [vmem:[%s2613_s15 + $0x50] sm:$0xff] }
 0x74e   :  { %1423 = vmatpush.msrb.mxu2 %v1408_v53 }
 0x74f   :  { %1201 = vrot.lane.b32.xlu0 %v1191_v63, %s1760_s10  ;;  %v1406_v63 = vld [vmem:[%s2613_s15 + $0x40] sm:$0xff] }
 0x750   :  { %v1186_v2 = vpop.f32.mrf.mxu2 }
 0x751   :  { %v1187_v1 = vadd.f32 %v1186_v2, %v1140_v61  ;;  %v1407_v61 = vld [vmem:[%s2613_s15 + $0x48] sm:$0xff]  ;;  %v1405_v2 = vld [vmem:[%s2613_s15 + $0x38] sm:$0xff] }
 0x752   :  { %1424 = vmatpush.msrb.mxu2 %v1407_v61 }
 0x753   :  { %v1192_v37 = vmax.f32 %v1187_v1, 0.0  ;;  %v1403_v1 = vld [vmem:[%s2613_s15 + $0x28] sm:$0xff] }
 0x754   :  { %1425 = vmatpush.msrb.mxu2 %v1406_v63 }
 0x755   :  { %1203 = vrot.lane.b32.xlu1 %v1192_v37, %s1760_s10 }
 0x756   :  { %1426 = vmatpush.msrb.mxu2 %v1405_v2 }
 0x757   :  { %1199 = vrot.lane.b32.xlu0 %v1190_v23, %s1760_s10 }
 0x758   :  { %1427 = vmatpush.msrb.mxu2 %v1404_v34 }
 0x75a   :  { %1428 = vmatpush.msrb.mxu2 %v1403_v1 }
 0x75c   :  { %1429 = vmatpush.msrb.mxu2 %v1402_v28 }
 0x75e   :  { %1430 = vmatpush.msrb.mxu2 %v1401_v44 }
 0x760   :  { %1431 = vmatpush.msrb.mxu2 %v1400_v20 }
 0x762   :  { %1432 = vmatpush.msrb.mxu2 %v1399_v4 }
 0x764   :  { %1433 = vmatpush.msrb.mxu2 %v1398_v5 }
 0x7a1   :  { %v1198_v33 = vpop.permute.xlu2 %1197 }
 0x7a2   :  { %1214 = vst.msk [vmem:[#allocation2] sm:$0xff] %vm1213_vm13, %v1198_v33 }
 0x7a9   :  { %v1221_v55 = vld [vmem:[#allocation2] sm:$0xff] }
 0x7c1   :  { %v1202_v8 = vpop.permute.xlu0 %1201 }
 0x7c2   :  { %1217 = vst.msk [vmem:[#allocation2 + $0x18] sm:$0xff] %vm1213_vm13, %v1202_v8 }
 0x7c7   :  { %v1204_v62 = vpop.permute.xlu1 %1203 }
 0x7c8   :  { %v1206_v25 = vsel %vm158_vm1, %v1202_v8, %v1204_v62  ;;  %1219 = vst.msk [vmem:[#allocation2 + $0x28] sm:$0xff] %vm158_vm1, %v1204_v62 }
 0x7c9   :  { %v1200_v27 = vpop.permute.xlu0 %1199  ;;  %v1224_v10 = vld [vmem:[#allocation2 + $0x18] sm:$0xff]  ;;  %1264 = vmatpush.msra.mxu3 %v1206_v25 }
 0x7ca   :  { %v1205_v21 = vsel %vm158_vm1, %v1198_v33, %v1200_v27  ;;  %1216 = vst.msk [vmem:[#allocation2 + $0x10] sm:$0xff] %vm158_vm1, %v1200_v27  ;;  %1244 = vmatpush.msrb.mxu1 %v1224_v10  ;;  %v1542_v27 = vld [vmem:[#allocation3] ss:$0 sm:$0xff] }
 0x7cb   :  { %1265 = vmatpush.msra.mxu3 %v1205_v21 }
 0x7cc   :  { %1245 = vmatpush.msrb.mxu1 %v1221_v55  ;;  %1461 = vmatmul.msk.f32.vlgmr.msra.gmra.mxu3 %vm241_vm7, %v1220_v0 }
 0x7cd   :  { %1460 = vmatmul.msk.f32.vlgmr.msrb.gmra.mxu1 %vm241_vm7, %v1220_v0  ;;  %1337 = vmatpush.msrb.mxu3 %v1305_v11 }
 0x7cf   :  { %v1226_v13 = vld [vmem:[#allocation2 + $0x28] sm:$0xff]  ;;  %1338 = vmatpush.msrb.mxu3 %v1304_v26 }
 0x7d0   :  { %1284 = vmatpush.msra.mxu1 %v1226_v13 }
 0x7d1   :  { %v1223_v3 = vld [vmem:[#allocation2 + $0x10] sm:$0xff]  ;;  %1339 = vmatpush.msrb.mxu3 %v1303_v14 }
 0x7d2   :  { %1285 = vmatpush.msra.mxu1 %v1223_v3 }
 0x7d3   :  { %1340 = vmatpush.msrb.mxu3 %v1302_v15 }
 0x7d4   :  { %1385 = vmatpush.msrb.mxu1 %v1329_v17 }
 0x7d5   :  { %1462 = vmatmul.msk.f32.vlgmr.msra.gmra.mxu1 %vm241_vm7, %v1220_v0  ;;  %1341 = vmatpush.msrb.mxu3 %v1301_v16 }
 0x7d6   :  { %1386 = vmatpush.msrb.mxu1 %v1328_v19 }
 0x7d7   :  { %1342 = vmatpush.msrb.mxu3 %v1300_v22 }
 0x7d8   :  { %1387 = vmatpush.msrb.mxu1 %v1327_v35 }
 0x7d9   :  { %1343 = vmatpush.msrb.mxu3 %v1299_v24 }
 0x7da   :  { %1388 = vmatpush.msrb.mxu1 %v1326_v39 }
 0x7db   :  { %1344 = vmatpush.msrb.mxu3 %v1298_v59 }
 0x7dc   :  { %1389 = vmatpush.msrb.mxu1 %v1325_v41 }
 0x7dd   :  { %1345 = vmatpush.msrb.mxu3 %v1297_v45 }
 0x7de   :  { %1390 = vmatpush.msrb.mxu1 %v1324_v42 }
 0x7df   :  { %1346 = vmatpush.msrb.mxu3 %v1296_v46 }
 0x7e0   :  { %1391 = vmatpush.msrb.mxu1 %v1323_v47 }
 0x7e1   :  { %1347 = vmatpush.msrb.mxu3 %v1295_v58 }
 0x7e2   :  { %1392 = vmatpush.msrb.mxu1 %v1322_v18 }
 0x7e3   :  { %1348 = vmatpush.msrb.mxu3 %v1294_v60 }
 0x7e5   :  { %1349 = vmatpush.msrb.mxu3 %v1293_v30 }
 0x7e7   :  { %1350 = vmatpush.msrb.mxu3 %v1292_v31 }
 0x7e9   :  { %1351 = vmatpush.msrb.mxu3 %v1291_v32 }
 0x7eb   :  { %1352 = vmatpush.msrb.mxu3 %v1290_v51 }
 0x84a   :  { %v1247_v37 = vpop.f32.mrf.mxu1 }
 0x84b   :  { %1353 = vmatmul.f32.vlgmr.msrb.gmra.mxu3 %v1247_v37 }
 0x84f   :  { %v1267_v23 = vpop.f32.mrf.mxu3 }
 0x850   :  { %1373 = vmatmul.f32.vlgmr.msra.gmra.mxu0 %v1267_v23 }
 0x852   :  { %v1287_v33 = vpop.f32.mrf.mxu1 }
 0x853   :  { %1463 = vmatmul.msk.f32.vlgmr.msrb.gmra.mxu1 %vm158_vm1, %v1287_v33  ;;  %vm1438_vm1 = vcmask 1024  }
 0x8cd   :  { %v1374_v9 = vpop.f32.mrf.mxu0 }
 0x8ce   :  { %v1354_v8 = vpop.f32.mrf.mxu3 }
 0x8cf   :  { %v1355_v56 = vadd.f32 %v1541_v6, %v1354_v8 }
 0x8d0   :  { %v1394_v7 = vpop.f32.mrf.mxu1 }
 0x8d1   :  { %v1375_v62 = vadd.f32 %v1374_v9, %v1355_v56 }
 0x8d3   :  { %v1395_v49 = vadd.f32 %v1394_v7, %v1375_v62 }
 0x8d5   :  { %v1397_v25 = vmax.f32 %v1395_v49, 0.0 }
 0x8d7   :  { %1434 = vmatmul.f32.vlgmr.msrb.gmra.mxu2 %v1397_v25 }
 0x95a   :  { %v1435_v10 = vpop.f32.mrf.mxu2 }
 0x95b   :  { %v1436_v57 = vadd.f32 %v1542_v27, %v1435_v10 }
 0x95d   :  { %1439 = vst.msk [vmem:[%s2615_s17] sm:$0x3] %vm1438_vm1, %v1436_v57 }
 0x95e   :  { %1444 = vsyncpa [#allocation5], 1 }
 0x95f   :  { %1445 = vsyncpa [#allocation7], 1 }
 0x960   :  { %1446 = vsyncpa [#allocation10], 1 }

</bundles_post_ra>
